<compile_context>
chip_gen: v7x
topology: tpu7x:2x2x1
jax: 0.10.0
libtpu: 0.0.40
codegen_flags: <defaults>
</compile_context>

<pallas_src>
import jax
import jax.numpy as jnp
from jax.experimental import pallas as pl
from jax.experimental.pallas import tpu as pltpu


_VMEM_LIMIT_BYTES = 32 * 1024 * 1024    # <= physical VMEM on v5e/v6e/v7x
_INPUT_VMEM_BUDGET = 20 * 1024 * 1024   # for 2 inputs x 2 pipeline buffers
_FAST_PATH_BYTES = 1 << 20              # below this, XLA fusion beats any kernel


def _l2norm_kernel(s0_ref, s1_ref, o_ref):
    # Blocks are (tb, D).  Accumulate in f32 regardless of input dtype.
    d = s0_ref[...].astype(jnp.float32) - s1_ref[...].astype(jnp.float32)
    dsq = d * d
    # Lane-dense row sum: (1, D) . (tb, D)^T -> (1, tb) via the standard
    # "q @ k^T" contraction on the MXU.  This keeps the output block lane
    # dense so the writeback DMA is an unmasked vst.
    ones = jnp.ones((1, dsq.shape[1]), jnp.float32)
    o_ref[...] = jax.lax.dot_general(
        ones, dsq,
        dimension_numbers=(((1,), (1,)), ((), ())),
        preferred_element_type=jnp.float32)


def _round_up(x, m):
    return ((x + m - 1) // m) * m


def _choose_tb(B, D, itemsize):
    """Pick a lane-multiple batch tile that keeps the pipelined inputs in VMEM."""
    per_row_bytes = 2 * 2 * D * itemsize          # 2 inputs x 2 pipeline buffers
    tb = _INPUT_VMEM_BUDGET // max(per_row_bytes, 1)
    tb = (min(tb, 1024) // 128) * 128
    if tb < 128:
        return None                               # D too wide for a 128-row tile
    tb = min(tb, _round_up(B, 128))               # don't over-pad small B
    if pl.cdiv(B, tb) < 2 and B > 256:            # give v7x's 2 TCs >=2 grid steps
        tb = max(128, _round_up(pl.cdiv(B, 2), 128))
    return tb


def l2norm_ref(skill0, skill1):
    # Pure-JAX reference (mirrors the PyTorch forward exactly).
    return jnp.sum((skill0 - skill1) ** 2, axis=1, keepdims=True)


def l2norm(skill0, skill1):
    """Pallas equivalent of L2Norm.forward(skill0, skill1).

    skill0, skill1: (B, D) arrays of the same shape.
    Returns (B, 1): squared L2 distance per row (keepdim over dim 1).
    """
    assert skill0.shape == skill1.shape and skill0.ndim == 2
    B, D = skill0.shape
    out_dtype = jnp.result_type(skill0.dtype, skill1.dtype)
    itemsize = max(jnp.dtype(skill0.dtype).itemsize,
                   jnp.dtype(skill1.dtype).itemsize)

    total_input_bytes = 2 * B * D * itemsize
    tb = _choose_tb(B, D, itemsize)
    if total_input_bytes < _FAST_PATH_BYTES or tb is None:
        # Tiny problem (launch-bound) or D too wide for a 128-row tile.
        # TODO(synk): for very large D, add a second 'arbitrary' grid axis over
        # D with an f32 VMEM accumulator (P3 pattern) instead of falling back.
        return l2norm_ref(skill0, skill1).astype(out_dtype)

    grid_b = pl.cdiv(B, tb)
    b_pad = grid_b * tb

    cost = pl.CostEstimate(
        flops=5 * B * D,                      # sub + square + row-sum contraction
        transcendentals=0,
        bytes_accessed=2 * B * D * itemsize + b_pad * 4,
    )

    out_row = pl.pallas_call(
        _l2norm_kernel,
        out_shape=jax.ShapeDtypeStruct((1, b_pad), jnp.float32),
        grid_spec=pltpu.PrefetchScalarGridSpec(
            num_scalar_prefetch=0,
            grid=(grid_b,),
            in_specs=[
                pl.BlockSpec((tb, D), lambda i: (i, 0)),
                pl.BlockSpec((tb, D), lambda i: (i, 0)),
            ],
            out_specs=pl.BlockSpec((1, tb), lambda i: (0, i)),
        ),
        compiler_params=pltpu.CompilerParams(
            dimension_semantics=("parallel",),
            vmem_limit_bytes=_VMEM_LIMIT_BYTES,
        ),
        cost_estimate=cost,
    )(skill0, skill1)

    # Lanes >= B come from the padded partial last block; slice them away and
    # restore the PyTorch (B, 1) keepdim layout and input dtype.
    return out_row[0, :B].reshape(B, 1).astype(out_dtype)


if __name__ == "__main__":
    key = jax.random.PRNGKey(0)
    k0, k1, k2, k3 = jax.random.split(key, 4)

    # Small shape consistent with the module (batch=8, hidden=32) -> fast path.
    B0, D0 = 8, 32
    a0 = jax.random.normal(k0, (B0, D0), dtype=jnp.float32)
    b0 = jax.random.normal(k1, (B0, D0), dtype=jnp.float32)
    out0 = jax.block_until_ready(l2norm(a0, b0))
    ref0 = l2norm_ref(a0, b0)
    assert out0.shape == (B0, 1), out0.shape
    assert jnp.allclose(out0, ref0, rtol=1e-5, atol=1e-5)

    # Shape that exercises the Pallas kernel: >=2 grid steps (megacore) and a
    # partial last block (B % tb != 0) with lane-dense writeback.
    B1, D1 = 1000, 384
    a1 = jax.random.normal(k2, (B1, D1), dtype=jnp.float32)
    b1 = jax.random.normal(k3, (B1, D1), dtype=jnp.float32)
    out1 = jax.block_until_ready(l2norm(a1, b1))
    ref1 = l2norm_ref(a1, b1)
    assert out1.shape == (B1, 1), out1.shape
    assert jnp.allclose(out1, ref1, rtol=1e-4, atol=1e-4), (out1[:4], ref1[:4])

    print("KERNEL_OK")
</pallas_src>

<mosaic_0001>
module attributes {stable_mosaic.version = 11 : i64} {
  func.func @_l2norm_kernel(%arg0: i32, %arg1: memref<512x384xf32, #tpu.memory_space<vmem>>, %arg2: memref<512x384xf32, #tpu.memory_space<vmem>>, %arg3: memref<1x512xf32, #tpu.memory_space<vmem>>) attributes {dimension_semantics = [#tpu.dimension_semantics<parallel>], iteration_bounds = array<i64: 2>, scalar_prefetch = 0 : i64, scratch_operands = 0 : i64, tpu.core_type = #tpu.core_type<tc>, window_params = [{transform_indices = @transform_0, window_bounds = array<i64: 512, 384>}, {transform_indices = @transform_1, window_bounds = array<i64: 512, 384>}, {transform_indices = @transform_2, window_bounds = array<i64: 1, 512>}]} {
    %c0 = arith.constant 0 : index
    %c0_0 = arith.constant 0 : index
    %0 = vector.load %arg1[%c0, %c0_0] : memref<512x384xf32, #tpu.memory_space<vmem>>, vector<512x384xf32>
    %c0_1 = arith.constant 0 : index
    %c0_2 = arith.constant 0 : index
    %1 = vector.load %arg2[%c0_1, %c0_2] : memref<512x384xf32, #tpu.memory_space<vmem>>, vector<512x384xf32>
    %2 = arith.subf %0, %1 : vector<512x384xf32>
    %3 = arith.mulf %2, %2 : vector<512x384xf32>
    %cst = arith.constant 1.000000e+00 : f32
    %4 = vector.broadcast %cst : f32 to vector<1x384xf32>
    %cst_3 = arith.constant dense<0.000000e+00> : vector<1x512xf32>
    %5 = tpu.matmul %4, %3, %cst_3 {dimension_numbers = #tpu.dot_dimension_numbers<[1], [1], [0], [0], [0, 0, 1, 0], [], []>} : vector<1x384xf32>, vector<512x384xf32>, vector<1x512xf32> -> vector<1x512xf32>
    %c0_4 = arith.constant 0 : index
    %c0_5 = arith.constant 0 : index
    %6 = vector.load %arg3[%c0_4, %c0_5] : memref<1x512xf32, #tpu.memory_space<vmem>>, vector<1x512xf32>
    tpu.vector_store %arg3[%c0_4, %c0_5], %5 {strides = array<i32>} : memref<1x512xf32, #tpu.memory_space<vmem>>, vector<1x512xf32>,
    return
  }
  func.func @transform_0(%arg0: i32) -> (i32, i32) {
    %c0_i32 = arith.constant 0 : i32
    %c0_i32_0 = arith.constant 0 : i32
    return %arg0, %c0_i32 : i32, i32
  }
  func.func @transform_1(%arg0: i32) -> (i32, i32) {
    %c0_i32 = arith.constant 0 : i32
    %c0_i32_0 = arith.constant 0 : i32
    return %arg0, %c0_i32 : i32, i32
  }
  func.func @transform_2(%arg0: i32) -> (i32, i32) {
    %c0_i32 = arith.constant 0 : i32
    %c0_i32_0 = arith.constant 0 : i32
    return %c0_i32, %arg0 : i32, i32
  }
}

</mosaic_0001>

<bundles_post_ra>
// kernel: tpu_custom_call.1
= control target key start
LH: loop header
LB: loop body
LE: loop exit
PB: predicated region body
PF: predicated region fallthrough
CT: control target
= control target key end

     0   :  { %7 = vsyncpa [#allocation3], 0  ;;  %s2526_s0 = inlined_call_operand.hbm [shape: f32[1000,384], index: 0, kind: input, shape index: {}]   ;;  %s2527_s1 = inlined_call_operand.hbm [shape: f32[1000,384], index: 1, kind: input, shape index: {}]   ;;  %s2528_s2 = inlined_call_operand.hbm [shape: f32[1,1024], index: 2, kind: output, shape index: {}]  }
   0x1   :  { %9 = vsyncpa [#allocation3 + $0x1], 0 }
   0x2   :  { %10 = vsyncpa [#allocation6], 0 }
   0x3   :  { %12 = vsyncpa [#allocation6 + $0x1], 0 }
   0x4   :  { %13 = vsyncpa [#allocation4], 0 }
   0x5   :  { %15 = vsyncpa [#allocation4 + $0x1], 0  ;;  %s1918_s9 = smov 0   ;;  %s1920_s10 = smov 0  }
   0x6   :  { %s1922_s11 = smov 0   ;;  %s1924_s12 = smov 0  }
   0x7 LB: > { %s1939_s13 = sadd.s32 4294967295, %s1892_s12   ;;  %s1425_s14 = sadd.s32 4294967294, %s1892_s12   ;;  %s1892_s12 = sphi %s1924_s12, %s2541_s12   ;;  %s1888_s11 = sphi %s1922_s11, %s2540_s11   ;;  %s1884_s10 = sphi %s1920_s10, %s2539_s10   ;;  %s1880_s9 = sphi %s1918_s9, %s2538_s9  }
   0x8   : > { %s1943_s15 = sadd.s32 1, %s1892_s12   ;;  %s28_s16 = sadd.s32 1, %s1888_s11 }
   0x9   : > { %s25_s17 = ssub.s32 %s1892_s12, %s1943_s15  ;;  %p35_p0 = scmp.ne.s32.totalorder %s1888_s11, %s1884_s10 }
   0xa   : > { %p26_p1 = scmp.eq.s32.totalorder %s25_s17, 0  ;;  %p36_p2 = scmp.eq.s32.totalorder %s1892_s12, 0 }
   0xb   : > { %p41_p3 = scmp.ne.s32.totalorder %s1884_s10, %s1880_s9  ;;  %p42_p4 = scmp.eq.s32.totalorder %s1939_s13, 0 }
   0xc   : > { %s1955_s18 = scalar_select %p26_p1, %s1888_s11, %s28_s16  }
   0xd   : > { %p1957_p5 = por %p36_p2, %p35_p0  ;;  %p1961_p6 = por %p42_p4, %p41_p3 }
   0xe   : > { %p91_p7 = scmp.eq.s32.totalorder %s1939_s13, 1  ;;  %p97_p8 = scmp.eq.s32.totalorder %s1425_s14, 1 }
   0xf   : > { %p2529_p11 = scmp.ge.s32.totalorder %s1892_s12, 2 }
  0x10   : > { %p1966_p9 = por %p91_p7, %p35_p0  ;;  %p1970_p10 = por %p97_p8, %p41_p3 }
  0x11   : > { %113 = sbr.rel (%p2529_p11) target bundleno = 96 (0x60), region = 16 }
  0x12   : > { %s2533_s21 = scalar_select %p1966_p9, 1, 0 }
  0x13   : > { %s2534_s22 = scalar_select %p1970_p10, 1, 0 }
  0x18   : > { %116 = sbr.rel (!%p1957_p5) target bundleno = 60 (0x3c), region = 20  ;;  %s117_s23 = sand.u32 (%p1957_p5), 1, %s1888_s11  }
  0x19   : > { %s1428_s24 = sshll.u32 (%p1957_p5), %s1892_s12, 6  ;;  %s1714_s25 = smul.u32 (%p1957_p5), 1536, %s117_s23 }
  0x1a   : > { %s123_s26 = ssub.s32 (%p1957_p5), 125, %s1428_s24  ;;  %s1984_s29 = scalar_lea.sflag (%p1957_p5), [#allocation3], %s117_s23 }
  0x1b   : > { %p124_p12 = scmp.lt.s32.totalorder (%p1957_p5), %s123_s26, 64  ;;  %s121_s30 = scalar_lea.vmem (%p1957_p5), [#allocation2], %s1714_s25 }
  0x1f   : > { %s2543_s26 = smov (!%p124_p12, %s123_s26), 64 }
  0x20   : > { %s1981_s27 = smul.u32 384, %s2543_s26 }
  0x22   : > { %s129_s28 = ssub.s32 24576, %s1981_s27 }
  0x23   : > { %130 = vsyncadd %s1984_s29, %s129_s28  ;;  %p1431_p13 = scmp.ne.s32.totalorder %s1981_s27, 0  ;;  %s1715_s3 = smul.u32 24576, %s1892_s12 }
  0x24   : > { %s136_s4 = sshll.u32 %s121_s30, 4  ;;  %s1770_s17 = scalar_lea.hbm %s2526_s0, 48000  ;;  %s1994_s4 = int_to_ptr.vmem [resolvable:$true] %s136_s4 }
  0x25   : > { %s1992_s7 = scalar_lea.hbm %s2526_s0, %s1715_s3 }
  0x26   : > { %s1766_s8 = scalar_lea.hbm %s1992_s7, %s1981_s27  ;;  %p1771_p3 = scmp.lt.u32.totalorder %s1992_s7, %s2526_s0 }
  0x27   : > { %p1767_p0 = scmp.ne.s32.totalorder %s1992_s7, %s1766_s8  ;;  %p1772_p4 = scmp.lt.u32.totalorder %s1770_s17, %s1766_s8 }
  0x28   : > { %p1774_p8 = scmp.lt.u32.totalorder %s1766_s8, %s1992_s7 }
  0x29   : > { %p1768_p1 = pnand %p1767_p0, %p1431_p13  ;;  %p1773_p7 = por %p1772_p4, %p1771_p3 }
  0x2b   : > { %p1769_p2 = pneg %p1768_p1  ;;  %p1775_p12 = por %p1774_p8, %p1773_p7 }
  0x2d   : > { %p1776_p11 = pnand %p1775_p12, %p1769_p2 }
  0x2f   : > { %1779 = shalt.err (!%p1776_p11)
}
  0x30   : > { %s1780_s25 = scalar_lea.vmem %s1994_s4, %s1981_s27  ;;  %s1894_s26 = smov [#allocation2]  }
  0x31   : > { %p1781_p0 = scmp.ne.s32.totalorder %s1994_s4, %s1780_s25  ;;  %s1784_s28 = sshll.u32 %s1894_s26, 4  ;;  %s1785_s28 = int_to_ptr.vmem [resolvable:$false] %s1784_s28 }
  0x32   : > { %s1786_s30 = scalar_lea.vmem %s1785_s28, 49152  ;;  %p1787_p9 = scmp.lt.s32.totalorder %s1994_s4, %s1785_s28 }
  0x33   : > { %p1782_p1 = pnand %p1781_p0, %p1431_p13  ;;  %p1788_p3 = scmp.lt.s32.totalorder %s1786_s30, %s1780_s25 }
  0x35   : > { %p1783_p10 = pneg %p1782_p1  ;;  %p1789_p4 = por %p1788_p3, %p1787_p9 }
  0x37   : > { %p1790_p7 = pnand %p1789_p4, %p1783_p10 }
  0x39   : > { %1793 = shalt.err (!%p1790_p7)
}
  0x3a   : > { %s1895_s3 = smov 384   ;;  %s1896_s5 = smov 24  }
  0x3b   : > { %142 = dma.hbm_to_vmem [thread:$0]  (%p1431_p13), %s1992_s7, %s1981_s27, %s1994_s4, %s1984_s29, %s1895_s3, %s1895_s3, %s1896_s5  }
  0x3c PF: > { %145 = sbr.rel (!%p1957_p5) target bundleno = 96 (0x60), region = 24  ;;  %s146_s6 = sand.u32 (%p1957_p5), 1, %s1888_s11  }
  0x3d   : > { %s1435_s8 = sshll.u32 (%p1957_p5), %s1892_s12, 6  ;;  %s1716_s14 = smul.u32 (%p1957_p5), 1536, %s146_s6 }
  0x3e   : > { %s152_s16 = ssub.s32 (%p1957_p5), 125, %s1435_s8  ;;  %s2028_s24 = scalar_lea.sflag (%p1957_p5), [#allocation6], %s146_s6 }
  0x3f   : > { %p153_p9 = scmp.lt.s32.totalorder (%p1957_p5), %s152_s16, 64  ;;  %s150_s27 = scalar_lea.vmem (%p1957_p5), [#allocation5], %s1716_s14 }
  0x43   : > { %s2545_s16 = smov (!%p153_p9, %s152_s16), 64 }
  0x44   : > { %s2025_s17 = smul.u32 384, %s2545_s16 }
  0x46   : > { %s158_s23 = ssub.s32 24576, %s2025_s17 }
  0x47   : > { %159 = vsyncadd %s2028_s24, %s158_s23  ;;  %p1438_p5 = scmp.ne.s32.totalorder %s2025_s17, 0  ;;  %s1717_s19 = smul.u32 24576, %s1892_s12 }
  0x48   : > { %s165_s29 = sshll.u32 %s150_s27, 4  ;;  %s1798_s3 = scalar_lea.hbm %s2527_s1, 48000  ;;  %s2038_s29 = int_to_ptr.vmem [resolvable:$true] %s165_s29 }
  0x49   : > { %s2036_s25 = scalar_lea.hbm %s2527_s1, %s1717_s19 }
  0x4a   : > { %s1794_s26 = scalar_lea.hbm %s2036_s25, %s2025_s17  ;;  %p1799_p2 = scmp.lt.u32.totalorder %s2036_s25, %s2527_s1 }
  0x4b   : > { %p1795_p10 = scmp.ne.s32.totalorder %s2036_s25, %s1794_s26  ;;  %p1800_p8 = scmp.lt.u32.totalorder %s1798_s3, %s1794_s26 }
  0x4c   : > { %p1802_p0 = scmp.lt.u32.totalorder %s1794_s26, %s2036_s25 }
  0x4d   : > { %p1796_p11 = pnand %p1795_p10, %p1438_p5  ;;  %p1801_p12 = por %p1800_p8, %p1799_p2 }
  0x4f   : > { %p1797_p13 = pneg %p1796_p11  ;;  %p1803_p1 = por %p1802_p0, %p1801_p12 }
  0x51   : > { %p1804_p3 = pnand %p1803_p1, %p1797_p13 }
  0x53   : > { %1807 = shalt.err (!%p1804_p3)
}
  0x54   : > { %s1808_s8 = scalar_lea.vmem %s2038_s29, %s2025_s17  ;;  %s1897_s14 = smov [#allocation5]  }
  0x55   : > { %p1809_p4 = scmp.ne.s32.totalorder %s2038_s29, %s1808_s8  ;;  %s1812_s16 = sshll.u32 %s1897_s14, 4  ;;  %s1813_s16 = int_to_ptr.vmem [resolvable:$false] %s1812_s16 }
  0x56   : > { %s1814_s23 = scalar_lea.vmem %s1813_s16, 49152  ;;  %p1815_p10 = scmp.lt.s32.totalorder %s2038_s29, %s1813_s16 }
  0x57   : > { %p1810_p7 = pnand %p1809_p4, %p1438_p5  ;;  %p1816_p11 = scmp.lt.s32.totalorder %s1814_s23, %s1808_s8 }
  0x59   : > { %p1811_p9 = pneg %p1810_p7  ;;  %p1817_p2 = por %p1816_p11, %p1815_p10 }
  0x5b   : > { %p1818_p8 = pnand %p1817_p2, %p1811_p9 }
  0x5d   : > { %1821 = shalt.err (!%p1818_p8)
}
  0x5e   : > { %s1898_s27 = smov 384   ;;  %s1899_s19 = smov 24  }
  0x5f   : > { %171 = dma.hbm_to_vmem [thread:$0]  (%p1438_p5), %s2036_s25, %s2025_s17, %s2038_s29, %s2028_s24, %s1898_s27, %s1898_s27, %s1899_s19  }
  0x60 PF: > { %p1442_p13 = scmp.ge.s32.totalorder %s1892_s12, 1  ;;  %p173_p12 = scmp.lt.s32.totalorder %s1892_s12, 3 }
  0x62   : > { %p174_p0 = pnand %p1442_p13, %p173_p12 }
  0x63   : > { %s2068_s4 = sand.u32 (!%p174_p0), 1, %s1884_s10  }
  0x64   : > { %177 = sbr.rel (%p174_p0) target bundleno = 550 (0x226), region = 28  ;;  %s180_s26 = scalar_lea.sflag (!%p174_p0), [#allocation3], %s2068_s4 }
  0x65   : > { %s1718_s7 = smul.u32 (!%p174_p0), 1536, %s2068_s4 }
  0x67   : > { %s2072_s28 = scalar_lea.vmem (!%p174_p0), [#allocation2], %s1718_s7 }
  0x6b   : > { %1867 = dma.done.wait (%p1961_p6), %s180_s26, 24576  }
  0x6c   : > { %1869 = vsyncadd (%p1961_p6), %s180_s26, 4294942720  ;;  %s189_s17 = scalar_lea.sflag [#allocation6], %s2068_s4  ;;  %s2079_s24 = scalar_lea.vmem [#allocation5], %s1718_s7 }
  0x6d   : > { %1871 = dma.done.wait (%p1961_p6), %s189_s17, 24576  }
  0x6e   : > { %1873 = vsyncadd (%p1961_p6), %s189_s17, 4294942720  ;;  %v232_v0 = vld [vmem:[%s2072_s28 + $0x8] sm:$0xff]  ;;  %v235_v1 = vld [vmem:[%s2072_s28 + $0x20] sm:$0xff]  ;;  %v1900_v29 = vmov 1.0   ;;  %s1443_s20 = sshll.u32 %s2068_s4, 2  ;;  %s1449_s29 = sshll.u32 %s1939_s13, 6 }
  0x6f   : > { %v424_v2 = vld [vmem:[%s2079_s24 + $0x8] sm:$0xff]  ;;  %v427_v3 = vld [vmem:[%s2079_s24 + $0x20] sm:$0xff]  ;;  %v234_v14 = vld [vmem:[%s2072_s28 + $0x18] sm:$0xff]  ;;  %1063 = vmatprep.mubr.f32.mxu0 %v1900_v29  ;;  %1205 = vmatprep.mubr.f32.mxu1 %v1900_v29  ;;  %s217_s25 = scalar_lea.vmem [#allocation7], %s1443_s20  ;;  %s2482_s6 = scalar_lea.hbm %s2528_s2, %s1449_s29 }
  0x70   : > { %v616_v4 = vsub.f32 %v232_v0, %v424_v2  ;;  %v328_v5 = vld [vmem:[%s2072_s28 + $0x308] sm:$0xff]  ;;  %v331_v6 = vld [vmem:[%s2072_s28 + $0x320] sm:$0xff]  ;;  %v619_v7 = vsub.f32 %v235_v1, %v427_v3  ;;  %v426_v16 = vld [vmem:[%s2079_s24 + $0x18] sm:$0xff]  ;;  %s1332_s30 = sshll.u32 %s217_s25, 4  ;;  %s1318_s8 = scalar_lea.sflag [#allocation4], %s2068_s4  ;;  %s2484_s30 = int_to_ptr.vmem [resolvable:$true] %s1332_s30 }
  0x71   : > { %v520_v8 = vld [vmem:[%s2079_s24 + $0x308] sm:$0xff]  ;;  %v523_v9 = vld [vmem:[%s2079_s24 + $0x320] sm:$0xff]  ;;  %v618_v19 = vsub.f32 %v234_v14, %v426_v16  ;;  %v330_v21 = vld [vmem:[%s2072_s28 + $0x318] sm:$0xff]  ;;  %s1822_s14 = scalar_lea.vmem %s2484_s30, 64  ;;  %p2535_p5 = scmp.ne.s32.totalorder %s2533_s21, 0 }
  0x72   : > { %v231_v10 = vld [vmem:[%s2072_s28] sm:$0xff]  ;;  %v808_v11 = vmul.f32 %v616_v4, %v616_v4  ;;  %v712_v12 = vsub.f32 %v328_v5, %v520_v8  ;;  %v715_v13 = vsub.f32 %v331_v6, %v523_v9  ;;  %v811_v17 = vmul.f32 %v619_v7, %v619_v7  ;;  %v522_v25 = vld [vmem:[%s2079_s24 + $0x318] sm:$0xff]  ;;  %v241_v28 = vld [vmem:[%s2072_s28 + $0x50] sm:$0xff]  ;;  %p1823_p6 = scmp.ne.s32.totalorder %s2484_s30, %s1822_s14  ;;  %s1902_s13 = smov [#allocation7]  }
  0x73   : > { %v423_v15 = vld [vmem:[%s2079_s24] sm:$0xff]  ;;  %v238_v27 = vld [vmem:[%s2072_s28 + $0x38] sm:$0xff]  ;;  %v810_v32 = vmul.f32 %v618_v19, %v618_v19  ;;  %v714_v33 = vsub.f32 %v330_v21, %v522_v25  ;;  %v433_v35 = vld [vmem:[%s2079_s24 + $0x50] sm:$0xff]  ;;  %s1826_s16 = sshll.u32 %s1902_s13, 4  ;;  %s1827_s16 = int_to_ptr.vmem [resolvable:$false] %s1826_s16 }
  0x74   : > { %v615_v18 = vsub.f32 %v231_v10, %v423_v15  ;;  %v327_v20 = vld [vmem:[%s2072_s28 + $0x300] sm:$0xff]  ;;  %v904_v23 = vmul.f32 %v712_v12, %v712_v12  ;;  %v907_v24 = vmul.f32 %v715_v13, %v715_v13  ;;  %v1518_v30 = vpack.c.bf16 %v811_v17, %v808_v11  ;;  %v430_v34 = vld [vmem:[%s2079_s24 + $0x38] sm:$0xff]  ;;  %v337_v41 = vld [vmem:[%s2072_s28 + $0x350] sm:$0xff]  ;;  %p1824_p1 = pnand %p1823_p6, %p2535_p5  ;;  %s1828_s23 = scalar_lea.vmem %s1827_s16, 128 }
  0x75   : > { %v519_v22 = vld [vmem:[%s2079_s24 + $0x300] sm:$0xff]  ;;  %v334_v36 = vld [vmem:[%s2072_s28 + $0x338] sm:$0xff]  ;;  %v622_v39 = vsub.f32 %v238_v27, %v430_v34  ;;  %v625_v40 = vsub.f32 %v241_v28, %v433_v35  ;;  %v529_v43 = vld [vmem:[%s2079_s24 + $0x350] sm:$0xff]  ;;  %v906_v45 = vmul.f32 %v714_v33, %v714_v33  ;;  %p1829_p4 = scmp.lt.s32.totalorder %s2484_s30, %s1827_s16  ;;  %p1830_p7 = scmp.lt.s32.totalorder %s1828_s23, %s1822_s14 }
  0x76   : > { %v711_v26 = vsub.f32 %v327_v20, %v519_v22  ;;  %v807_v31 = vmul.f32 %v615_v18, %v615_v18  ;;  %v1614_v37 = vpack.c.bf16 %v907_v24, %v904_v23  ;;  %v526_v42 = vld [vmem:[%s2079_s24 + $0x338] sm:$0xff]  ;;  %1519 = vmatprep.subr.bf16.mxu0 %v1518_v30  ;;  %v721_v47 = vsub.f32 %v337_v41, %v529_v43  ;;  %v237_v48 = vld [vmem:[%s2072_s28 + $0x30] sm:$0xff]  ;;  %v240_v49 = vld [vmem:[%s2072_s28 + $0x48] sm:$0xff]  ;;  %p1825_p3 = pneg %p1824_p1 }
  0x77   : > { %v718_v46 = vsub.f32 %v334_v36, %v526_v42  ;;  %v429_v50 = vld [vmem:[%s2079_s24 + $0x30] sm:$0xff]  ;;  %v814_v51 = vmul.f32 %v622_v39, %v622_v39  ;;  %v817_v52 = vmul.f32 %v625_v40, %v625_v40  ;;  %v432_v53 = vld [vmem:[%s2079_s24 + $0x48] sm:$0xff]  ;;  %v247_v4 = vld [vmem:[%s2072_s28 + $0x80] sm:$0xff]  ;;  %p1831_p9 = por %p1830_p7, %p1829_p4 }
  0x78   : > { %v903_v38 = vmul.f32 %v711_v26, %v711_v26  ;;  %v1520_v44 = vpack.c.bf16 %v810_v32, %v807_v31  ;;  %1615 = vmatprep.subr.bf16.mxu1 %v1614_v37  ;;  %v621_v54 = vsub.f32 %v237_v48, %v429_v50  ;;  %v333_v55 = vld [vmem:[%s2072_s28 + $0x330] sm:$0xff]  ;;  %v336_v56 = vld [vmem:[%s2072_s28 + $0x348] sm:$0xff]  ;;  %v913_v59 = vmul.f32 %v721_v47, %v721_v47  ;;  %v439_v6 = vld [vmem:[%s2079_s24 + $0x80] sm:$0xff] }
  0x79   : > { %v910_v58 = vmul.f32 %v718_v46, %v718_v46  ;;  %v624_v60 = vsub.f32 %v240_v49, %v432_v53  ;;  %v525_v61 = vld [vmem:[%s2079_s24 + $0x330] sm:$0xff]  ;;  %v528_v62 = vld [vmem:[%s2079_s24 + $0x348] sm:$0xff]  ;;  %v1522_v0 = vpack.c.bf16 %v817_v52, %v814_v51  ;;  %v631_v10 = vsub.f32 %v247_v4, %v439_v6  ;;  %v343_v12 = vld [vmem:[%s2072_s28 + $0x380] sm:$0xff]  ;;  %p1832_p10 = pnand %p1831_p9, %p1825_p3 }
  0x7a   : > { %1521 = vmatpush1.bf16.xpose.msra.mxu0 %v1520_v44  ;;  %v1616_v57 = vpack.c.bf16 %v906_v45, %v903_v38  ;;  %v244_v63 = vld [vmem:[%s2072_s28 + $0x68] sm:$0xff]  ;;  %v813_v1 = vmul.f32 %v621_v54, %v621_v54  ;;  %v717_v2 = vsub.f32 %v333_v55, %v525_v61  ;;  %v720_v3 = vsub.f32 %v336_v56, %v528_v62  ;;  %v535_v16 = vld [vmem:[%s2079_s24 + $0x380] sm:$0xff]  ;;  %v246_v19 = vld [vmem:[%s2072_s28 + $0x78] sm:$0xff] }
  0x7b   : > { %v436_v5 = vld [vmem:[%s2079_s24 + $0x68] sm:$0xff]  ;;  %v1618_v7 = vpack.c.bf16 %v913_v59, %v910_v58  ;;  %v816_v8 = vmul.f32 %v624_v60, %v624_v60  ;;  %1523 = vmatprep.subr.bf16.mxu0 %v1522_v0  ;;  %v243_v18 = vld [vmem:[%s2072_s28 + $0x60] sm:$0xff]  ;;  %v823_v22 = vmul.f32 %v631_v10, %v631_v10  ;;  %v727_v23 = vsub.f32 %v343_v12, %v535_v16  ;;  %v438_v25 = vld [vmem:[%s2079_s24 + $0x78] sm:$0xff] }
  0x7c   : > { %1617 = vmatpush1.bf16.xpose.msra.mxu1 %v1616_v57  ;;  %v628_v9 = vsub.f32 %v244_v63, %v436_v5  ;;  %v340_v11 = vld [vmem:[%s2072_s28 + $0x368] sm:$0xff]  ;;  %v909_v14 = vmul.f32 %v717_v2, %v717_v2  ;;  %v912_v15 = vmul.f32 %v720_v3, %v720_v3  ;;  %v435_v24 = vld [vmem:[%s2079_s24 + $0x60] sm:$0xff]  ;;  %v630_v31 = vsub.f32 %v246_v19, %v438_v25  ;;  %v342_v32 = vld [vmem:[%s2072_s28 + $0x378] sm:$0xff] }
  0x7d   : > { %v532_v13 = vld [vmem:[%s2079_s24 + $0x368] sm:$0xff]  ;;  %1619 = vmatprep.subr.bf16.mxu1 %v1618_v7  ;;  %v1524_v20 = vpack.c.bf16 %v816_v8, %v813_v1  ;;  %v339_v26 = vld [vmem:[%s2072_s28 + $0x360] sm:$0xff]  ;;  %v627_v30 = vsub.f32 %v243_v18, %v435_v24  ;;  %v534_v34 = vld [vmem:[%s2079_s24 + $0x378] sm:$0xff]  ;;  %v919_v36 = vmul.f32 %v727_v23, %v727_v23 }
  0x7e   : > { %v724_v17 = vsub.f32 %v340_v11, %v532_v13  ;;  %v820_v21 = vmul.f32 %v628_v9, %v628_v9  ;;  %v1620_v27 = vpack.c.bf16 %v912_v15, %v909_v14  ;;  %v531_v33 = vld [vmem:[%s2079_s24 + $0x360] sm:$0xff]  ;;  %v726_v38 = vsub.f32 %v342_v32, %v534_v34  ;;  %v250_v39 = vld [vmem:[%s2072_s28 + $0x98] sm:$0xff]  ;;  %v253_v40 = vld [vmem:[%s2072_s28 + $0xb0] sm:$0xff] }
  0x7f   : > { %v723_v37 = vsub.f32 %v339_v26, %v531_v33  ;;  %v442_v41 = vld [vmem:[%s2079_s24 + $0x98] sm:$0xff]  ;;  %v445_v42 = vld [vmem:[%s2079_s24 + $0xb0] sm:$0xff]  ;;  %v819_v47 = vmul.f32 %v627_v30, %v627_v30  ;;  %v822_v48 = vmul.f32 %v630_v31, %v630_v31  ;;  %v252_v56 = vld [vmem:[%s2072_s28 + $0xa8] sm:$0xff] }
  0x80   : > { %v916_v28 = vmul.f32 %v724_v17, %v724_v17  ;;  %v1526_v35 = vpack.c.bf16 %v823_v22, %v820_v21  ;;  %v634_v43 = vsub.f32 %v250_v39, %v442_v41  ;;  %v346_v44 = vld [vmem:[%s2072_s28 + $0x398] sm:$0xff]  ;;  %v349_v45 = vld [vmem:[%s2072_s28 + $0x3b0] sm:$0xff]  ;;  %v637_v49 = vsub.f32 %v253_v40, %v445_v42  ;;  %v444_v58 = vld [vmem:[%s2079_s24 + $0xa8] sm:$0xff] }
  0x81   : > { %v538_v50 = vld [vmem:[%s2079_s24 + $0x398] sm:$0xff]  ;;  %v541_v51 = vld [vmem:[%s2079_s24 + $0x3b0] sm:$0xff]  ;;  %v915_v59 = vmul.f32 %v723_v37, %v723_v37  ;;  %v918_v60 = vmul.f32 %v726_v38, %v726_v38  ;;  %v348_v63 = vld [vmem:[%s2072_s28 + $0x3a8] sm:$0xff]  ;;  %v1528_v6 = vpack.c.bf16 %v822_v48, %v819_v47  ;;  %v636_v8 = vsub.f32 %v252_v56, %v444_v58 }
  0x82   : > { %1525 = vmatpush1.bf16.xpose.msra.mxu0 %v1524_v20  ;;  %v1622_v46 = vpack.c.bf16 %v919_v36, %v916_v28  ;;  %v249_v52 = vld [vmem:[%s2072_s28 + $0x90] sm:$0xff]  ;;  %v826_v53 = vmul.f32 %v634_v43, %v634_v43  ;;  %v730_v54 = vsub.f32 %v346_v44, %v538_v50  ;;  %v733_v55 = vsub.f32 %v349_v45, %v541_v51  ;;  %v540_v3 = vld [vmem:[%s2079_s24 + $0x3a8] sm:$0xff]  ;;  %v259_v5 = vld [vmem:[%s2072_s28 + $0xe0] sm:$0xff] }
  0x83   : > { %1527 = vmatprep.subr.bf16.mxu0 %v1526_v35  ;;  %v441_v57 = vld [vmem:[%s2079_s24 + $0x90] sm:$0xff]  ;;  %v829_v61 = vmul.f32 %v637_v49, %v637_v49  ;;  %v256_v4 = vld [vmem:[%s2072_s28 + $0xc8] sm:$0xff]  ;;  %v451_v10 = vld [vmem:[%s2079_s24 + $0xe0] sm:$0xff]  ;;  %v1624_v18 = vpack.c.bf16 %v918_v60, %v915_v59  ;;  %v732_v20 = vsub.f32 %v348_v63, %v540_v3  ;;  %v828_v26 = vmul.f32 %v636_v8, %v636_v8 }
  0x84   : > { %1621 = vmatpush1.bf16.xpose.msra.mxu1 %v1620_v27  ;;  %v345_v62 = vld [vmem:[%s2072_s28 + $0x390] sm:$0xff]  ;;  %v922_v1 = vmul.f32 %v730_v54, %v730_v54  ;;  %v925_v2 = vmul.f32 %v733_v55, %v733_v55  ;;  %v633_v7 = vsub.f32 %v249_v52, %v441_v57  ;;  %v448_v9 = vld [vmem:[%s2079_s24 + $0xc8] sm:$0xff]  ;;  %v643_v14 = vsub.f32 %v259_v5, %v451_v10  ;;  %v355_v15 = vld [vmem:[%s2072_s28 + $0x3e0] sm:$0xff] }
  0x85   : > { %v537_v0 = vld [vmem:[%s2079_s24 + $0x390] sm:$0xff]  ;;  %1623 = vmatprep.subr.bf16.mxu1 %v1622_v46  ;;  %v352_v11 = vld [vmem:[%s2072_s28 + $0x3c8] sm:$0xff]  ;;  %v1530_v12 = vpack.c.bf16 %v829_v61, %v826_v53  ;;  %v640_v13 = vsub.f32 %v256_v4, %v448_v9  ;;  %v547_v17 = vld [vmem:[%s2079_s24 + $0x3e0] sm:$0xff]  ;;  %v924_v37 = vmul.f32 %v732_v20, %v732_v20 }
  0x86   : > { %v544_v16 = vld [vmem:[%s2079_s24 + $0x3c8] sm:$0xff]  ;;  %v729_v19 = vsub.f32 %v345_v62, %v537_v0  ;;  %v1626_v21 = vpack.c.bf16 %v925_v2, %v922_v1  ;;  %v739_v23 = vsub.f32 %v355_v15, %v547_v17  ;;  %v255_v24 = vld [vmem:[%s2072_s28 + $0xc0] sm:$0xff]  ;;  %v825_v25 = vmul.f32 %v633_v7, %v633_v7  ;;  %v258_v27 = vld [vmem:[%s2072_s28 + $0xd8] sm:$0xff] }
  0x87   : > { %v736_v22 = vsub.f32 %v352_v11, %v544_v16  ;;  %v447_v28 = vld [vmem:[%s2079_s24 + $0xc0] sm:$0xff]  ;;  %v450_v30 = vld [vmem:[%s2079_s24 + $0xd8] sm:$0xff]  ;;  %v832_v31 = vmul.f32 %v640_v13, %v640_v13  ;;  %v835_v32 = vmul.f32 %v643_v14, %v643_v14  ;;  %v265_v38 = vld [vmem:[%s2072_s28 + $0x110] sm:$0xff] }
  0x88   : > { %v351_v33 = vld [vmem:[%s2072_s28 + $0x3c0] sm:$0xff]  ;;  %v354_v34 = vld [vmem:[%s2072_s28 + $0x3d8] sm:$0xff]  ;;  %v921_v36 = vmul.f32 %v729_v19, %v729_v19  ;;  %v457_v40 = vld [vmem:[%s2079_s24 + $0x110] sm:$0xff]  ;;  %v931_v42 = vmul.f32 %v739_v23, %v739_v23  ;;  %v1532_v46 = vpack.c.bf16 %v828_v26, %v825_v25  ;;  %v639_v47 = vsub.f32 %v255_v24, %v447_v28 }
  0x89   : > { %v262_v35 = vld [vmem:[%s2072_s28 + $0xf8] sm:$0xff]  ;;  %v928_v41 = vmul.f32 %v736_v22, %v736_v22  ;;  %v543_v43 = vld [vmem:[%s2079_s24 + $0x3c0] sm:$0xff]  ;;  %v642_v48 = vsub.f32 %v258_v27, %v450_v30  ;;  %v361_v49 = vld [vmem:[%s2072_s28 + $0x410] sm:$0xff]  ;;  %v1534_v52 = vpack.c.bf16 %v835_v32, %v832_v31  ;;  %v649_v54 = vsub.f32 %v265_v38, %v457_v40 }
  0x8a   : > { %1529 = vmatpush1.bf16.xpose.msra.mxu0 %v1528_v6  ;;  %v454_v39 = vld [vmem:[%s2079_s24 + $0xf8] sm:$0xff]  ;;  %v553_v51 = vld [vmem:[%s2079_s24 + $0x410] sm:$0xff]  ;;  %v1628_v55 = vpack.c.bf16 %v924_v37, %v921_v36  ;;  %v735_v56 = vsub.f32 %v351_v33, %v543_v43  ;;  %v831_v62 = vmul.f32 %v639_v47, %v639_v47  ;;  %v264_v0 = vld [vmem:[%s2072_s28 + $0x108] sm:$0xff] }
  0x8b   : > { %1531 = vmatprep.subr.bf16.mxu0 %v1530_v12  ;;  %v546_v44 = vld [vmem:[%s2079_s24 + $0x3d8] sm:$0xff]  ;;  %v646_v53 = vsub.f32 %v262_v35, %v454_v39  ;;  %v1630_v58 = vpack.c.bf16 %v931_v42, %v928_v41  ;;  %v745_v60 = vsub.f32 %v361_v49, %v553_v51  ;;  %v261_v61 = vld [vmem:[%s2072_s28 + $0xf0] sm:$0xff]  ;;  %v834_v63 = vmul.f32 %v642_v48, %v642_v48  ;;  %v456_v2 = vld [vmem:[%s2079_s24 + $0x108] sm:$0xff] }
  0x8c   : > { %1625 = vmatpush1.bf16.xpose.msra.mxu1 %v1624_v18  ;;  %v358_v45 = vld [vmem:[%s2072_s28 + $0x3f8] sm:$0xff]  ;;  %v738_v57 = vsub.f32 %v354_v34, %v546_v44  ;;  %v453_v1 = vld [vmem:[%s2079_s24 + $0xf0] sm:$0xff]  ;;  %v841_v4 = vmul.f32 %v649_v54, %v649_v54  ;;  %v360_v6 = vld [vmem:[%s2072_s28 + $0x408] sm:$0xff]  ;;  %v927_v8 = vmul.f32 %v735_v56, %v735_v56  ;;  %v648_v20 = vsub.f32 %v264_v0, %v456_v2 }
  0x8d   : > { %1627 = vmatprep.subr.bf16.mxu1 %v1626_v21  ;;  %v550_v50 = vld [vmem:[%s2079_s24 + $0x3f8] sm:$0xff]  ;;  %v838_v3 = vmul.f32 %v646_v53, %v646_v53  ;;  %v357_v5 = vld [vmem:[%s2072_s28 + $0x3f0] sm:$0xff]  ;;  %v268_v7 = vld [vmem:[%s2072_s28 + $0x128] sm:$0xff]  ;;  %v937_v14 = vmul.f32 %v745_v60, %v745_v60  ;;  %v1536_v18 = vpack.c.bf16 %v834_v63, %v831_v62  ;;  %v645_v19 = vsub.f32 %v261_v61, %v453_v1 }
  0x8e   : > { %v742_v59 = vsub.f32 %v358_v45, %v550_v50  ;;  %v930_v9 = vmul.f32 %v738_v57, %v738_v57  ;;  %v271_v10 = vld [vmem:[%s2072_s28 + $0x140] sm:$0xff]  ;;  %v460_v11 = vld [vmem:[%s2079_s24 + $0x128] sm:$0xff]  ;;  %v549_v15 = vld [vmem:[%s2079_s24 + $0x3f0] sm:$0xff]  ;;  %v840_v36 = vmul.f32 %v648_v20, %v648_v20 }
  0x8f   : > { %v463_v12 = vld [vmem:[%s2079_s24 + $0x140] sm:$0xff]  ;;  %v552_v16 = vld [vmem:[%s2079_s24 + $0x408] sm:$0xff]  ;;  %v1538_v24 = vpack.c.bf16 %v841_v4, %v838_v3  ;;  %v652_v25 = vsub.f32 %v268_v7, %v460_v11  ;;  %v741_v28 = vsub.f32 %v357_v5, %v549_v15  ;;  %v837_v35 = vmul.f32 %v645_v19, %v645_v19  ;;  %v270_v37 = vld [vmem:[%s2072_s28 + $0x138] sm:$0xff] }
  0x90   : > { %v934_v13 = vmul.f32 %v742_v59, %v742_v59  ;;  %v364_v17 = vld [vmem:[%s2072_s28 + $0x428] sm:$0xff]  ;;  %v367_v21 = vld [vmem:[%s2072_s28 + $0x440] sm:$0xff]  ;;  %v655_v26 = vsub.f32 %v271_v10, %v463_v12  ;;  %v1632_v27 = vpack.c.bf16 %v930_v9, %v927_v8  ;;  %v744_v30 = vsub.f32 %v360_v6, %v552_v16  ;;  %v462_v39 = vld [vmem:[%s2079_s24 + $0x138] sm:$0xff] }
  0x91   : > { %v556_v22 = vld [vmem:[%s2079_s24 + $0x428] sm:$0xff]  ;;  %v559_v23 = vld [vmem:[%s2079_s24 + $0x440] sm:$0xff]  ;;  %v844_v40 = vmul.f32 %v652_v25, %v652_v25  ;;  %v366_v43 = vld [vmem:[%s2072_s28 + $0x438] sm:$0xff]  ;;  %v933_v45 = vmul.f32 %v741_v28, %v741_v28  ;;  %v654_v57 = vsub.f32 %v270_v37, %v462_v39 }
  0x92   : > { %1533 = vmatpush1.bf16.xpose.msra.mxu0 %v1532_v46  ;;  %v1634_v31 = vpack.c.bf16 %v937_v14, %v934_v13  ;;  %v748_v32 = vsub.f32 %v364_v17, %v556_v22  ;;  %v751_v33 = vsub.f32 %v367_v21, %v559_v23  ;;  %v267_v34 = vld [vmem:[%s2072_s28 + $0x120] sm:$0xff]  ;;  %v847_v41 = vmul.f32 %v655_v26, %v655_v26  ;;  %v274_v44 = vld [vmem:[%s2072_s28 + $0x158] sm:$0xff]  ;;  %v277_v47 = vld [vmem:[%s2072_s28 + $0x170] sm:$0xff] }
  0x93   : > { %1535 = vmatprep.subr.bf16.mxu0 %v1534_v52  ;;  %v459_v38 = vld [vmem:[%s2079_s24 + $0x120] sm:$0xff]  ;;  %v936_v46 = vmul.f32 %v744_v30, %v744_v30  ;;  %v466_v48 = vld [vmem:[%s2079_s24 + $0x158] sm:$0xff]  ;;  %v469_v49 = vld [vmem:[%s2079_s24 + $0x170] sm:$0xff]  ;;  %v846_v8 = vmul.f32 %v654_v57, %v654_v57 }
  0x94   : > { %1629 = vmatpush1.bf16.xpose.msra.mxu1 %v1628_v55  ;;  %v363_v42 = vld [vmem:[%s2072_s28 + $0x420] sm:$0xff]  ;;  %v940_v50 = vmul.f32 %v748_v32, %v748_v32  ;;  %v943_v51 = vmul.f32 %v751_v33, %v751_v33  ;;  %v558_v53 = vld [vmem:[%s2079_s24 + $0x438] sm:$0xff]  ;;  %v1540_v55 = vpack.c.bf16 %v840_v36, %v837_v35  ;;  %v651_v56 = vsub.f32 %v267_v34, %v459_v38  ;;  %v565_v60 = vld [vmem:[%s2079_s24 + $0x470] sm:$0xff] }
  0x95   : > { %1631 = vmatprep.subr.bf16.mxu1 %v1630_v58  ;;  %v555_v52 = vld [vmem:[%s2079_s24 + $0x420] sm:$0xff]  ;;  %v370_v54 = vld [vmem:[%s2072_s28 + $0x458] sm:$0xff]  ;;  %v373_v58 = vld [vmem:[%s2072_s28 + $0x470] sm:$0xff]  ;;  %v1542_v61 = vpack.c.bf16 %v847_v41, %v844_v40  ;;  %v658_v62 = vsub.f32 %v274_v44, %v466_v48  ;;  %v661_v63 = vsub.f32 %v277_v47, %v469_v49  ;;  %v1636_v0 = vpack.c.bf16 %v936_v46, %v933_v45 }
  0x96   : > { %v562_v59 = vld [vmem:[%s2079_s24 + $0x458] sm:$0xff]  ;;  %v747_v1 = vsub.f32 %v363_v42, %v555_v52  ;;  %v750_v2 = vsub.f32 %v366_v43, %v558_v53  ;;  %v1638_v3 = vpack.c.bf16 %v943_v51, %v940_v50  ;;  %v757_v5 = vsub.f32 %v373_v58, %v565_v60  ;;  %v273_v6 = vld [vmem:[%s2072_s28 + $0x150] sm:$0xff]  ;;  %v276_v9 = vld [vmem:[%s2072_s28 + $0x168] sm:$0xff] }
  0x97   : > { %v754_v4 = vsub.f32 %v370_v54, %v562_v59  ;;  %v843_v7 = vmul.f32 %v651_v56, %v651_v56  ;;  %v465_v10 = vld [vmem:[%s2079_s24 + $0x150] sm:$0xff]  ;;  %v468_v11 = vld [vmem:[%s2079_s24 + $0x168] sm:$0xff]  ;;  %v850_v12 = vmul.f32 %v658_v62, %v658_v62  ;;  %v853_v13 = vmul.f32 %v661_v63, %v661_v63  ;;  %v283_v19 = vld [vmem:[%s2072_s28 + $0x1a0] sm:$0xff] }
  0x98   : > { %v369_v14 = vld [vmem:[%s2072_s28 + $0x450] sm:$0xff]  ;;  %v372_v15 = vld [vmem:[%s2072_s28 + $0x468] sm:$0xff]  ;;  %v939_v17 = vmul.f32 %v747_v1, %v747_v1  ;;  %v475_v21 = vld [vmem:[%s2079_s24 + $0x1a0] sm:$0xff]  ;;  %v949_v23 = vmul.f32 %v757_v5, %v757_v5  ;;  %v657_v28 = vsub.f32 %v273_v6, %v465_v10  ;;  %v660_v30 = vsub.f32 %v276_v9, %v468_v11 }
  0x99   : > { %v280_v16 = vld [vmem:[%s2072_s28 + $0x188] sm:$0xff]  ;;  %v946_v22 = vmul.f32 %v754_v4, %v754_v4  ;;  %v571_v33 = vld [vmem:[%s2079_s24 + $0x4a0] sm:$0xff]  ;;  %v1546_v34 = vpack.c.bf16 %v853_v13, %v850_v12  ;;  %v667_v36 = vsub.f32 %v283_v19, %v475_v21  ;;  %v282_v46 = vld [vmem:[%s2072_s28 + $0x198] sm:$0xff] }
  0x9a   : > { %1537 = vmatpush1.bf16.xpose.msra.mxu0 %v1536_v18  ;;  %v942_v18 = vmul.f32 %v750_v2, %v750_v2  ;;  %v472_v20 = vld [vmem:[%s2079_s24 + $0x188] sm:$0xff]  ;;  %v279_v43 = vld [vmem:[%s2072_s28 + $0x180] sm:$0xff]  ;;  %v849_v44 = vmul.f32 %v657_v28, %v657_v28  ;;  %v852_v45 = vmul.f32 %v660_v30, %v660_v30  ;;  %v474_v48 = vld [vmem:[%s2079_s24 + $0x198] sm:$0xff] }
  0x9b   : > { %1539 = vmatprep.subr.bf16.mxu0 %v1538_v24  ;;  %v561_v24 = vld [vmem:[%s2079_s24 + $0x450] sm:$0xff]  ;;  %v564_v25 = vld [vmem:[%s2079_s24 + $0x468] sm:$0xff]  ;;  %v664_v35 = vsub.f32 %v280_v16, %v472_v20  ;;  %v1642_v40 = vpack.c.bf16 %v949_v23, %v946_v22  ;;  %v471_v47 = vld [vmem:[%s2079_s24 + $0x180] sm:$0xff]  ;;  %v859_v50 = vmul.f32 %v667_v36, %v667_v36  ;;  %v666_v2 = vsub.f32 %v282_v46, %v474_v48 }
  0x9c   : > { %1633 = vmatpush1.bf16.xpose.msra.mxu1 %v1632_v27  ;;  %v376_v26 = vld [vmem:[%s2072_s28 + $0x488] sm:$0xff]  ;;  %v1544_v27 = vpack.c.bf16 %v846_v8, %v843_v7  ;;  %v1640_v37 = vpack.c.bf16 %v942_v18, %v939_v17  ;;  %v753_v38 = vsub.f32 %v369_v14, %v561_v24  ;;  %v756_v39 = vsub.f32 %v372_v15, %v564_v25  ;;  %v375_v51 = vld [vmem:[%s2072_s28 + $0x480] sm:$0xff]  ;;  %v378_v52 = vld [vmem:[%s2072_s28 + $0x498] sm:$0xff] }
  0x9d   : > { %1635 = vmatprep.subr.bf16.mxu1 %v1634_v31  ;;  %v379_v31 = vld [vmem:[%s2072_s28 + $0x4a0] sm:$0xff]  ;;  %v568_v32 = vld [vmem:[%s2079_s24 + $0x488] sm:$0xff]  ;;  %v856_v49 = vmul.f32 %v664_v35, %v664_v35  ;;  %v286_v53 = vld [vmem:[%s2072_s28 + $0x1b8] sm:$0xff]  ;;  %v663_v1 = vsub.f32 %v279_v43, %v471_v47  ;;  %v858_v17 = vmul.f32 %v666_v2, %v666_v2 }
  0x9e   : > { %v760_v41 = vsub.f32 %v376_v26, %v568_v32  ;;  %v763_v42 = vsub.f32 %v379_v31, %v571_v33  ;;  %v945_v54 = vmul.f32 %v753_v38, %v753_v38  ;;  %v289_v56 = vld [vmem:[%s2072_s28 + $0x1d0] sm:$0xff]  ;;  %v478_v57 = vld [vmem:[%s2079_s24 + $0x1b8] sm:$0xff]  ;;  %v288_v18 = vld [vmem:[%s2072_s28 + $0x1c8] sm:$0xff] }
  0x9f   : > { %v481_v58 = vld [vmem:[%s2079_s24 + $0x1d0] sm:$0xff]  ;;  %v570_v62 = vld [vmem:[%s2079_s24 + $0x498] sm:$0xff]  ;;  %v1550_v6 = vpack.c.bf16 %v859_v50, %v856_v49  ;;  %v670_v7 = vsub.f32 %v286_v53, %v478_v57  ;;  %v855_v16 = vmul.f32 %v663_v1, %v663_v1  ;;  %v480_v20 = vld [vmem:[%s2079_s24 + $0x1c8] sm:$0xff] }
  0xa0   : > { %v952_v59 = vmul.f32 %v760_v41, %v760_v41  ;;  %v955_v60 = vmul.f32 %v763_v42, %v763_v42  ;;  %v382_v63 = vld [vmem:[%s2072_s28 + $0x4b8] sm:$0xff]  ;;  %v577_v5 = vld [vmem:[%s2079_s24 + $0x4d0] sm:$0xff]  ;;  %v673_v8 = vsub.f32 %v289_v56, %v481_v58  ;;  %v762_v11 = vsub.f32 %v378_v52, %v570_v62  ;;  %v384_v24 = vld [vmem:[%s2072_s28 + $0x4c8] sm:$0xff] }
  0xa1   : > { %v574_v4 = vld [vmem:[%s2079_s24 + $0x4b8] sm:$0xff]  ;;  %v285_v15 = vld [vmem:[%s2072_s28 + $0x1b0] sm:$0xff]  ;;  %v862_v21 = vmul.f32 %v670_v7, %v670_v7  ;;  %v292_v25 = vld [vmem:[%s2072_s28 + $0x1e8] sm:$0xff] }
  0xa2   : > { %1541 = vmatpush1.bf16.xpose.msra.mxu0 %v1540_v55  ;;  %v948_v55 = vmul.f32 %v756_v39, %v756_v39  ;;  %v1646_v12 = vpack.c.bf16 %v955_v60, %v952_v59  ;;  %v766_v13 = vsub.f32 %v382_v63, %v574_v4  ;;  %v477_v19 = vld [vmem:[%s2079_s24 + $0x1b0] sm:$0xff]  ;;  %v865_v22 = vmul.f32 %v673_v8, %v673_v8  ;;  %v295_v28 = vld [vmem:[%s2072_s28 + $0x200] sm:$0xff]  ;;  %v484_v30 = vld [vmem:[%s2079_s24 + $0x1e8] sm:$0xff] }
  0xa3   : > { %1543 = vmatprep.subr.bf16.mxu0 %v1542_v61  ;;  %v567_v61 = vld [vmem:[%s2079_s24 + $0x480] sm:$0xff]  ;;  %v381_v23 = vld [vmem:[%s2072_s28 + $0x4b0] sm:$0xff]  ;;  %v576_v35 = vld [vmem:[%s2079_s24 + $0x4c8] sm:$0xff]  ;;  %v669_v38 = vsub.f32 %v285_v15, %v477_v19  ;;  %v672_v39 = vsub.f32 %v288_v18, %v480_v20 }
  0xa4   : > { %1637 = vmatpush1.bf16.xpose.msra.mxu1 %v1636_v0  ;;  %v1548_v0 = vpack.c.bf16 %v852_v45, %v849_v44  ;;  %v1644_v9 = vpack.c.bf16 %v948_v55, %v945_v54  ;;  %v759_v10 = vsub.f32 %v375_v51, %v567_v61  ;;  %v487_v31 = vld [vmem:[%s2079_s24 + $0x200] sm:$0xff]  ;;  %v958_v32 = vmul.f32 %v766_v13, %v766_v13  ;;  %v388_v36 = vld [vmem:[%s2072_s28 + $0x4e8] sm:$0xff]  ;;  %v294_v55 = vld [vmem:[%s2072_s28 + $0x1f8] sm:$0xff] }
  0xa5   : > { %1639 = vmatprep.subr.bf16.mxu1 %v1638_v3  ;;  %v385_v3 = vld [vmem:[%s2072_s28 + $0x4d0] sm:$0xff]  ;;  %v580_v41 = vld [vmem:[%s2079_s24 + $0x4e8] sm:$0xff]  ;;  %v583_v42 = vld [vmem:[%s2079_s24 + $0x500] sm:$0xff]  ;;  %v1554_v43 = vpack.c.bf16 %v865_v22, %v862_v21  ;;  %v676_v44 = vsub.f32 %v292_v25, %v484_v30  ;;  %v679_v45 = vsub.f32 %v295_v28, %v487_v31  ;;  %v768_v48 = vsub.f32 %v384_v24, %v576_v35 }
  0xa6   : > { %v769_v14 = vsub.f32 %v385_v3, %v577_v5  ;;  %v951_v26 = vmul.f32 %v759_v10, %v759_v10  ;;  %v772_v50 = vsub.f32 %v388_v36, %v580_v41  ;;  %v291_v52 = vld [vmem:[%s2072_s28 + $0x1e0] sm:$0xff]  ;;  %v861_v53 = vmul.f32 %v669_v38, %v669_v38  ;;  %v486_v57 = vld [vmem:[%s2079_s24 + $0x1f8] sm:$0xff]  ;;  %v301_v1 = vld [vmem:[%s2072_s28 + $0x230] sm:$0xff] }
  0xa7   : > { %v864_v54 = vmul.f32 %v672_v39, %v672_v39  ;;  %v483_v56 = vld [vmem:[%s2079_s24 + $0x1e0] sm:$0xff]  ;;  %v868_v58 = vmul.f32 %v676_v44, %v676_v44  ;;  %v871_v59 = vmul.f32 %v679_v45, %v679_v45  ;;  %v390_v61 = vld [vmem:[%s2072_s28 + $0x4f8] sm:$0xff]  ;;  %v493_v3 = vld [vmem:[%s2079_s24 + $0x230] sm:$0xff] }
  0xa8   : > { %v961_v33 = vmul.f32 %v769_v14, %v769_v14  ;;  %v387_v60 = vld [vmem:[%s2072_s28 + $0x4e0] sm:$0xff]  ;;  %v298_v62 = vld [vmem:[%s2072_s28 + $0x218] sm:$0xff]  ;;  %v964_v4 = vmul.f32 %v772_v50, %v772_v50  ;;  %v675_v10 = vsub.f32 %v291_v52, %v483_v56  ;;  %v589_v14 = vld [vmem:[%s2079_s24 + $0x530] sm:$0xff] }
  0xa9   : > { %v490_v2 = vld [vmem:[%s2079_s24 + $0x218] sm:$0xff]  ;;  %v1558_v15 = vpack.c.bf16 %v871_v59, %v868_v58  ;;  %v297_v24 = vld [vmem:[%s2072_s28 + $0x210] sm:$0xff]  ;;  %v492_v30 = vld [vmem:[%s2079_s24 + $0x228] sm:$0xff] }
  0xaa   : > { %1545 = vmatpush1.bf16.xpose.msra.mxu0 %v1544_v27  ;;  %v954_v27 = vmul.f32 %v762_v11, %v762_v11  ;;  %v1650_v49 = vpack.c.bf16 %v961_v33, %v958_v32  ;;  %v582_v7 = vld [vmem:[%s2079_s24 + $0x4f8] sm:$0xff]  ;;  %v678_v11 = vsub.f32 %v294_v55, %v486_v57  ;;  %v867_v25 = vmul.f32 %v675_v10, %v675_v10  ;;  %v489_v28 = vld [vmem:[%s2079_s24 + $0x210] sm:$0xff]  ;;  %v304_v35 = vld [vmem:[%s2072_s28 + $0x248] sm:$0xff] }
  0xab   : > { %1547 = vmatprep.subr.bf16.mxu0 %v1546_v34  ;;  %v573_v34 = vld [vmem:[%s2079_s24 + $0x4b0] sm:$0xff]  ;;  %v394_v8 = vld [vmem:[%s2072_s28 + $0x518] sm:$0xff]  ;;  %v774_v20 = vsub.f32 %v390_v61, %v582_v7  ;;  %v307_v38 = vld [vmem:[%s2072_s28 + $0x260] sm:$0xff] }
  0xac   : > { %1641 = vmatpush1.bf16.xpose.msra.mxu1 %v1640_v37  ;;  %v1552_v37 = vpack.c.bf16 %v858_v17, %v855_v16  ;;  %v1648_v46 = vpack.c.bf16 %v954_v27, %v951_v26  ;;  %v765_v47 = vsub.f32 %v381_v23, %v573_v34  ;;  %v586_v13 = vld [vmem:[%s2079_s24 + $0x518] sm:$0xff]  ;;  %v682_v16 = vsub.f32 %v298_v62, %v490_v2  ;;  %v300_v27 = vld [vmem:[%s2072_s28 + $0x228] sm:$0xff]  ;;  %v393_v33 = vld [vmem:[%s2072_s28 + $0x510] sm:$0xff] }
  0xad   : > { %1643 = vmatprep.subr.bf16.mxu1 %v1642_v40  ;;  %v391_v40 = vld [vmem:[%s2072_s28 + $0x500] sm:$0xff]  ;;  %v685_v17 = vsub.f32 %v301_v1, %v493_v3  ;;  %v778_v22 = vsub.f32 %v394_v8, %v586_v13  ;;  %v870_v26 = vmul.f32 %v678_v11, %v678_v11  ;;  %v396_v34 = vld [vmem:[%s2072_s28 + $0x528] sm:$0xff]  ;;  %v498_v2 = vld [vmem:[%s2079_s24 + $0x258] sm:$0xff] }
  0xae   : > { %v775_v51 = vsub.f32 %v391_v40, %v583_v42  ;;  %v957_v63 = vmul.f32 %v765_v47, %v765_v47  ;;  %v874_v31 = vmul.f32 %v682_v16, %v682_v16  ;;  %v496_v39 = vld [vmem:[%s2079_s24 + $0x248] sm:$0xff]  ;;  %v499_v40 = vld [vmem:[%s2079_s24 + $0x260] sm:$0xff]  ;;  %v681_v47 = vsub.f32 %v297_v24, %v489_v28  ;;  %v310_v7 = vld [vmem:[%s2072_s28 + $0x278] sm:$0xff] }
  0xaf   : > { %v877_v32 = vmul.f32 %v685_v17, %v685_v17  ;;  %v970_v41 = vmul.f32 %v778_v22, %v778_v22  ;;  %v588_v44 = vld [vmem:[%s2079_s24 + $0x528] sm:$0xff]  ;;  %v303_v61 = vld [vmem:[%s2072_s28 + $0x240] sm:$0xff]  ;;  %v313_v10 = vld [vmem:[%s2072_s28 + $0x290] sm:$0xff] }
  0xb0   : > { %v967_v5 = vmul.f32 %v775_v51, %v775_v51  ;;  %v400_v45 = vld [vmem:[%s2072_s28 + $0x548] sm:$0xff]  ;;  %v595_v51 = vld [vmem:[%s2079_s24 + $0x560] sm:$0xff]  ;;  %v780_v57 = vsub.f32 %v396_v34, %v588_v44  ;;  %v873_v62 = vmul.f32 %v681_v47, %v681_v47  ;;  %v502_v11 = vld [vmem:[%s2079_s24 + $0x278] sm:$0xff] }
  0xb1   : > { %v592_v50 = vld [vmem:[%s2079_s24 + $0x548] sm:$0xff]  ;;  %v1562_v52 = vpack.c.bf16 %v877_v32, %v874_v31  ;;  %v495_v1 = vld [vmem:[%s2079_s24 + $0x240] sm:$0xff]  ;;  %v594_v16 = vld [vmem:[%s2079_s24 + $0x558] sm:$0xff] }
  0xb2   : > { %1549 = vmatpush1.bf16.xpose.msra.mxu0 %v1548_v0  ;;  %v960_v0 = vmul.f32 %v768_v48, %v768_v48  ;;  %v1654_v21 = vpack.c.bf16 %v967_v5, %v964_v4  ;;  %v684_v48 = vsub.f32 %v300_v27, %v492_v30  ;;  %v784_v59 = vsub.f32 %v400_v45, %v592_v50  ;;  %v399_v5 = vld [vmem:[%s2072_s28 + $0x540] sm:$0xff]  ;;  %v406_v17 = vld [vmem:[%s2072_s28 + $0x578] sm:$0xff]  ;;  %v309_v34 = vld [vmem:[%s2072_s28 + $0x270] sm:$0xff] }
  0xb3   : > { %1551 = vmatprep.subr.bf16.mxu0 %v1550_v6  ;;  %v579_v6 = vld [vmem:[%s2079_s24 + $0x4e0] sm:$0xff]  ;;  %v598_v22 = vld [vmem:[%s2079_s24 + $0x578] sm:$0xff]  ;;  %v316_v44 = vld [vmem:[%s2072_s28 + $0x2a8] sm:$0xff] }
  0xb4   : > { %1645 = vmatpush1.bf16.xpose.msra.mxu1 %v1644_v9  ;;  %v1556_v9 = vpack.c.bf16 %v864_v54, %v861_v53  ;;  %v1652_v18 = vpack.c.bf16 %v960_v0, %v957_v63  ;;  %v771_v19 = vsub.f32 %v387_v60, %v579_v6  ;;  %v688_v53 = vsub.f32 %v304_v35, %v496_v39  ;;  %v306_v0 = vld [vmem:[%s2072_s28 + $0x258] sm:$0xff]  ;;  %v504_v39 = vld [vmem:[%s2079_s24 + $0x288] sm:$0xff]  ;;  %v319_v47 = vld [vmem:[%s2072_s28 + $0x2c0] sm:$0xff] }
  0xb5   : > { %1647 = vmatprep.subr.bf16.mxu1 %v1646_v12  ;;  %v397_v12 = vld [vmem:[%s2072_s28 + $0x530] sm:$0xff]  ;;  %v691_v54 = vsub.f32 %v307_v38, %v499_v40  ;;  %v876_v63 = vmul.f32 %v684_v48, %v684_v48  ;;  %v402_v6 = vld [vmem:[%s2072_s28 + $0x558] sm:$0xff]  ;;  %v976_v13 = vmul.f32 %v784_v59, %v784_v59  ;;  %v790_v32 = vsub.f32 %v406_v17, %v598_v22  ;;  %v508_v48 = vld [vmem:[%s2079_s24 + $0x2a8] sm:$0xff] }
  0xb6   : > { %v781_v23 = vsub.f32 %v397_v12, %v589_v14  ;;  %v963_v36 = vmul.f32 %v771_v19, %v771_v19  ;;  %v880_v3 = vmul.f32 %v688_v53, %v688_v53  ;;  %v505_v12 = vld [vmem:[%s2079_s24 + $0x290] sm:$0xff]  ;;  %v687_v19 = vsub.f32 %v303_v61, %v495_v1  ;;  %v600_v53 = vld [vmem:[%s2079_s24 + $0x588] sm:$0xff] }
  0xb7   : > { %v883_v4 = vmul.f32 %v691_v54, %v691_v54  ;;  %v786_v30 = vsub.f32 %v402_v6, %v594_v16  ;;  %v501_v38 = vld [vmem:[%s2079_s24 + $0x270] sm:$0xff]  ;;  %v982_v50 = vmul.f32 %v790_v32, %v790_v32  ;;  %v412_v54 = vld [vmem:[%s2072_s28 + $0x5a8] sm:$0xff]  ;;  %v315_v6 = vld [vmem:[%s2072_s28 + $0x2a0] sm:$0xff] }
  0xb8   : > { %v973_v42 = vmul.f32 %v781_v23, %v781_v23  ;;  %v601_v23 = vld [vmem:[%s2079_s24 + $0x590] sm:$0xff]  ;;  %v879_v35 = vmul.f32 %v687_v19, %v687_v19  ;;  %v604_v59 = vld [vmem:[%s2079_s24 + $0x5a8] sm:$0xff]  ;;  %v322_v16 = vld [vmem:[%s2072_s28 + $0x2d8] sm:$0xff] }
  0xb9   : > { %v1566_v24 = vpack.c.bf16 %v883_v4, %v880_v3  ;;  %v796_v4 = vsub.f32 %v412_v54, %v604_v59  ;;  %v325_v19 = vld [vmem:[%s2072_s28 + $0x2f0] sm:$0xff]  ;;  %v610_v32 = vld [vmem:[%s2079_s24 + $0x5d8] sm:$0xff] }
  0xba   : > { %1553 = vmatpush1.bf16.xpose.msra.mxu0 %v1552_v37  ;;  %v966_v37 = vmul.f32 %v774_v20, %v774_v20  ;;  %v1658_v58 = vpack.c.bf16 %v973_v42, %v970_v41  ;;  %v690_v20 = vsub.f32 %v306_v0, %v498_v2  ;;  %v405_v42 = vld [vmem:[%s2072_s28 + $0x570] sm:$0xff] }
  0xbb   : > { %1555 = vmatprep.subr.bf16.mxu0 %v1554_v43  ;;  %v585_v43 = vld [vmem:[%s2079_s24 + $0x510] sm:$0xff]  ;;  %v988_v22 = vmul.f32 %v796_v4, %v796_v4 }
  0xbc   : > { %1649 = vmatpush1.bf16.xpose.msra.mxu1 %v1648_v46  ;;  %v1560_v46 = vpack.c.bf16 %v870_v26, %v867_v25  ;;  %v1656_v55 = vpack.c.bf16 %v966_v37, %v963_v36  ;;  %v777_v56 = vsub.f32 %v393_v33, %v585_v43  ;;  %v694_v25 = vsub.f32 %v310_v7, %v502_v11  ;;  %v312_v37 = vld [vmem:[%s2072_s28 + $0x288] sm:$0xff]  ;;  %v510_v11 = vld [vmem:[%s2079_s24 + $0x2b8] sm:$0xff]  ;;  %v569_v4 = vld [vmem:[%s2079_s24 + $0x490] sm:$0xff] }
  0xbd   : > { %1651 = vmatprep.subr.bf16.mxu1 %v1650_v49  ;;  %v403_v49 = vld [vmem:[%s2072_s28 + $0x560] sm:$0xff]  ;;  %v697_v26 = vsub.f32 %v313_v10, %v505_v12  ;;  %v882_v36 = vmul.f32 %v690_v20, %v690_v20  ;;  %v408_v43 = vld [vmem:[%s2072_s28 + $0x588] sm:$0xff]  ;;  %v514_v20 = vld [vmem:[%s2079_s24 + $0x2d8] sm:$0xff] }
  0xbe   : > { %v787_v60 = vsub.f32 %v403_v49, %v595_v51  ;;  %v969_v8 = vmul.f32 %v777_v56, %v777_v56  ;;  %v886_v40 = vmul.f32 %v694_v25, %v694_v25  ;;  %v511_v49 = vld [vmem:[%s2079_s24 + $0x2c0] sm:$0xff]  ;;  %v693_v56 = vsub.f32 %v309_v34, %v501_v38  ;;  %v606_v25 = vld [vmem:[%s2079_s24 + $0x5b8] sm:$0xff] }
  0xbf   : > { %v889_v41 = vmul.f32 %v697_v26, %v697_v26  ;;  %v792_v2 = vsub.f32 %v408_v43, %v600_v53  ;;  %v507_v10 = vld [vmem:[%s2079_s24 + $0x2a0] sm:$0xff]  ;;  %v418_v26 = vld [vmem:[%s2072_s28 + $0x5d8] sm:$0xff]  ;;  %v321_v43 = vld [vmem:[%s2072_s28 + $0x2d0] sm:$0xff] }
  0xc0   : > { %v979_v14 = vmul.f32 %v787_v60, %v787_v60  ;;  %v607_v60 = vld [vmem:[%s2079_s24 + $0x5c0] sm:$0xff]  ;;  %v885_v7 = vmul.f32 %v693_v56, %v693_v56  ;;  %v281_v53 = vld [vmem:[%s2072_s28 + $0x190] sm:$0xff]  ;;  %v284_v56 = vld [vmem:[%s2072_s28 + $0x1a8] sm:$0xff] }
  0xc1   : > { %v1570_v61 = vpack.c.bf16 %v889_v41, %v886_v40  ;;  %v802_v41 = vsub.f32 %v418_v26, %v610_v32 }
  0xc2   : > { %1557 = vmatpush1.bf16.xpose.msra.mxu0 %v1556_v9  ;;  %v972_v9 = vmul.f32 %v780_v57, %v780_v57  ;;  %v1662_v31 = vpack.c.bf16 %v979_v14, %v976_v13  ;;  %v696_v57 = vsub.f32 %v312_v37, %v504_v39  ;;  %v411_v14 = vld [vmem:[%s2072_s28 + $0x5a0] sm:$0xff] }
  0xc3   : > { %1559 = vmatprep.subr.bf16.mxu0 %v1558_v15  ;;  %v591_v15 = vld [vmem:[%s2079_s24 + $0x540] sm:$0xff]  ;;  %v994_v59 = vmul.f32 %v802_v41, %v802_v41 }
  0xc4   : > { %1653 = vmatpush1.bf16.xpose.msra.mxu1 %v1652_v18  ;;  %v1564_v18 = vpack.c.bf16 %v876_v63, %v873_v62  ;;  %v1660_v27 = vpack.c.bf16 %v972_v9, %v969_v8  ;;  %v783_v28 = vsub.f32 %v399_v5, %v591_v15  ;;  %v700_v62 = vsub.f32 %v316_v44, %v508_v48  ;;  %v318_v9 = vld [vmem:[%s2072_s28 + $0x2b8] sm:$0xff]  ;;  %v516_v48 = vld [vmem:[%s2079_s24 + $0x2e8] sm:$0xff]  ;;  %v575_v41 = vld [vmem:[%s2079_s24 + $0x4c0] sm:$0xff] }
  0xc5   : > { %1655 = vmatprep.subr.bf16.mxu1 %v1654_v21  ;;  %v409_v21 = vld [vmem:[%s2072_s28 + $0x590] sm:$0xff]  ;;  %v703_v63 = vsub.f32 %v319_v47, %v511_v49  ;;  %v888_v8 = vmul.f32 %v696_v57, %v696_v57  ;;  %v414_v15 = vld [vmem:[%s2072_s28 + $0x5b8] sm:$0xff] }
  0xc6   : > { %v793_v33 = vsub.f32 %v409_v21, %v601_v23  ;;  %v975_v45 = vmul.f32 %v783_v28, %v783_v28  ;;  %v892_v12 = vmul.f32 %v700_v62, %v700_v62  ;;  %v517_v21 = vld [vmem:[%s2079_s24 + $0x2f0] sm:$0xff]  ;;  %v699_v28 = vsub.f32 %v315_v6, %v507_v10  ;;  %v612_v62 = vld [vmem:[%s2079_s24 + $0x5e8] sm:$0xff] }
  0xc7   : > { %v895_v13 = vmul.f32 %v703_v63, %v703_v63  ;;  %v798_v39 = vsub.f32 %v414_v15, %v606_v25  ;;  %v513_v47 = vld [vmem:[%s2079_s24 + $0x2d0] sm:$0xff]  ;;  %v287_v25 = vld [vmem:[%s2072_s28 + $0x1c0] sm:$0xff] }
  0xc8   : > { %v985_v51 = vmul.f32 %v793_v33, %v793_v33  ;;  %v613_v33 = vld [vmem:[%s2079_s24 + $0x5f0] sm:$0xff]  ;;  %v891_v44 = vmul.f32 %v699_v28, %v699_v28  ;;  %v290_v28 = vld [vmem:[%s2072_s28 + $0x1d8] sm:$0xff] }
  0xc9   : > { %v1574_v34 = vpack.c.bf16 %v895_v13, %v892_v12  ;;  %v473_v57 = vld [vmem:[%s2079_s24 + $0x190] sm:$0xff] }
  0xca   : > { %1561 = vmatpush1.bf16.xpose.msra.mxu0 %v1560_v46  ;;  %v978_v46 = vmul.f32 %v786_v30, %v786_v30  ;;  %v1666_v3 = vpack.c.bf16 %v985_v51, %v982_v50  ;;  %v702_v30 = vsub.f32 %v318_v9, %v510_v11  ;;  %v417_v51 = vld [vmem:[%s2072_s28 + $0x5d0] sm:$0xff] }
  0xcb   : > { %1563 = vmatprep.subr.bf16.mxu0 %v1562_v52  ;;  %v597_v52 = vld [vmem:[%s2079_s24 + $0x570] sm:$0xff] }
  0xcc   : > { %1657 = vmatpush1.bf16.xpose.msra.mxu1 %v1656_v55  ;;  %v1568_v55 = vpack.c.bf16 %v882_v36, %v879_v35  ;;  %v1664_v0 = vpack.c.bf16 %v978_v46, %v975_v45  ;;  %v789_v1 = vsub.f32 %v405_v42, %v597_v52  ;;  %v706_v35 = vsub.f32 %v322_v16, %v514_v20  ;;  %v324_v46 = vld [vmem:[%s2072_s28 + $0x2e8] sm:$0xff]  ;;  %v377_v63 = vld [vmem:[%s2072_s28 + $0x490] sm:$0xff] }
  0xcd   : > { %1659 = vmatprep.subr.bf16.mxu1 %v1658_v58  ;;  %v415_v58 = vld [vmem:[%s2072_s28 + $0x5c0] sm:$0xff]  ;;  %v709_v36 = vsub.f32 %v325_v19, %v517_v21  ;;  %v894_v45 = vmul.f32 %v702_v30, %v702_v30  ;;  %v420_v52 = vld [vmem:[%s2072_s28 + $0x5e8] sm:$0xff]  ;;  %v761_v13 = vsub.f32 %v377_v63, %v569_v4  ;;  %v233_v15 = vld [vmem:[%s2072_s28 + $0x10] sm:$0xff] }
  0xce   : > { %v799_v5 = vsub.f32 %v415_v58, %v607_v60  ;;  %v981_v17 = vmul.f32 %v789_v1, %v789_v1  ;;  %v898_v49 = vmul.f32 %v706_v35, %v706_v35  ;;  %v476_v58 = vld [vmem:[%s2079_s24 + $0x1a8] sm:$0xff]  ;;  %v705_v1 = vsub.f32 %v321_v43, %v513_v47  ;;  %v425_v19 = vld [vmem:[%s2079_s24 + $0x10] sm:$0xff]  ;;  %v479_v30 = vld [vmem:[%s2079_s24 + $0x1c0] sm:$0xff] }
  0xcf   : > { %v901_v50 = vmul.f32 %v709_v36, %v709_v36  ;;  %v804_v11 = vsub.f32 %v420_v52, %v612_v62  ;;  %v428_v20 = vld [vmem:[%s2079_s24 + $0x28] sm:$0xff]  ;;  %v953_v32 = vmul.f32 %v761_v13, %v761_v13  ;;  %v383_v36 = vld [vmem:[%s2072_s28 + $0x4c0] sm:$0xff]  ;;  %v293_v62 = vld [vmem:[%s2072_s28 + $0x1f0] sm:$0xff] }
  0xd0   : > { %v991_v23 = vmul.f32 %v799_v5, %v799_v5  ;;  %v572_v5 = vld [vmem:[%s2079_s24 + $0x4a8] sm:$0xff]  ;;  %v897_v16 = vmul.f32 %v705_v1, %v705_v1  ;;  %v239_v52 = vld [vmem:[%s2072_s28 + $0x40] sm:$0xff]  ;;  %v581_v13 = vld [vmem:[%s2079_s24 + $0x4f0] sm:$0xff] }
  0xd1   : > { %v1578_v6 = vpack.c.bf16 %v901_v50, %v898_v49  ;;  %v524_v35 = vld [vmem:[%s2079_s24 + $0x328] sm:$0xff]  ;;  %v767_v50 = vsub.f32 %v383_v36, %v575_v41 }
  0xd2   : > { %1565 = vmatpush1.bf16.xpose.msra.mxu0 %v1564_v18  ;;  %v984_v18 = vmul.f32 %v792_v2, %v792_v2  ;;  %v1670_v40 = vpack.c.bf16 %v991_v23, %v988_v22  ;;  %v708_v2 = vsub.f32 %v324_v46, %v516_v48  ;;  %v329_v23 = vld [vmem:[%s2072_s28 + $0x310] sm:$0xff]  ;;  %v296_v1 = vld [vmem:[%s2072_s28 + $0x208] sm:$0xff] }
  0xd3   : > { %1567 = vmatprep.subr.bf16.mxu0 %v1566_v24  ;;  %v603_v24 = vld [vmem:[%s2079_s24 + $0x5a0] sm:$0xff]  ;;  %v959_v4 = vmul.f32 %v767_v50, %v767_v50 }
  0xd4   : > { %1661 = vmatpush1.bf16.xpose.msra.mxu1 %v1660_v27  ;;  %v1572_v27 = vpack.c.bf16 %v888_v8, %v885_v7  ;;  %v1668_v37 = vpack.c.bf16 %v984_v18, %v981_v17  ;;  %v795_v38 = vsub.f32 %v411_v14, %v603_v24  ;;  %v665_v7 = vsub.f32 %v281_v53, %v473_v57  ;;  %v236_v18 = vld [vmem:[%s2072_s28 + $0x28] sm:$0xff]  ;;  %v434_v57 = vld [vmem:[%s2079_s24 + $0x58] sm:$0xff]  ;;  %v587_v50 = vld [vmem:[%s2079_s24 + $0x520] sm:$0xff] }
  0xd5   : > { %1663 = vmatprep.subr.bf16.mxu1 %v1662_v31  ;;  %v421_v31 = vld [vmem:[%s2072_s28 + $0x5f0] sm:$0xff]  ;;  %v668_v8 = vsub.f32 %v284_v56, %v476_v58  ;;  %v900_v17 = vmul.f32 %v708_v2, %v708_v2  ;;  %v332_v24 = vld [vmem:[%s2072_s28 + $0x328] sm:$0xff]  ;;  %v431_v56 = vld [vmem:[%s2079_s24 + $0x40] sm:$0xff] }
  0xd6   : > { %v805_v42 = vsub.f32 %v421_v31, %v613_v33  ;;  %v987_v54 = vmul.f32 %v795_v38, %v795_v38  ;;  %v857_v21 = vmul.f32 %v665_v7, %v665_v7  ;;  %v482_v31 = vld [vmem:[%s2079_s24 + $0x1d8] sm:$0xff]  ;;  %v617_v38 = vsub.f32 %v233_v15, %v425_v19  ;;  %v485_v2 = vld [vmem:[%s2079_s24 + $0x1f0] sm:$0xff] }
  0xd7   : > { %v860_v22 = vmul.f32 %v668_v8, %v668_v8  ;;  %v716_v48 = vsub.f32 %v332_v24, %v524_v35  ;;  %v530_v7 = vld [vmem:[%s2079_s24 + $0x358] sm:$0xff]  ;;  %v389_v8 = vld [vmem:[%s2072_s28 + $0x4f0] sm:$0xff]  ;;  %v299_v35 = vld [vmem:[%s2072_s28 + $0x220] sm:$0xff] }
  0xd8   : > { %v997_v60 = vmul.f32 %v805_v42, %v805_v42  ;;  %v578_v42 = vld [vmem:[%s2079_s24 + $0x4d8] sm:$0xff]  ;;  %v809_v53 = vmul.f32 %v617_v38, %v617_v38  ;;  %v245_v24 = vld [vmem:[%s2072_s28 + $0x70] sm:$0xff] }
  0xd9   : > { %v1582_v43 = vpack.c.bf16 %v860_v22, %v857_v21  ;;  %v773_v22 = vsub.f32 %v389_v8, %v581_v13  ;;  %v302_v38 = vld [vmem:[%s2072_s28 + $0x238] sm:$0xff] }
  0xda   : > { %1569 = vmatpush1.bf16.xpose.msra.mxu0 %v1568_v55  ;;  %v990_v55 = vmul.f32 %v798_v39, %v798_v39  ;;  %v1674_v12 = vpack.c.bf16 %v997_v60, %v994_v59  ;;  %v620_v39 = vsub.f32 %v236_v18, %v428_v20  ;;  %v335_v60 = vld [vmem:[%s2072_s28 + $0x340] sm:$0xff] }
  0xdb   : > { %1571 = vmatprep.subr.bf16.mxu0 %v1570_v61  ;;  %v609_v61 = vld [vmem:[%s2079_s24 + $0x5d0] sm:$0xff]  ;;  %v965_v41 = vmul.f32 %v773_v22, %v773_v22 }
  0xdc   : > { %1665 = vmatpush1.bf16.xpose.msra.mxu1 %v1664_v0  ;;  %v1576_v0 = vpack.c.bf16 %v894_v45, %v891_v44  ;;  %v1672_v9 = vpack.c.bf16 %v990_v55, %v987_v54  ;;  %v801_v10 = vsub.f32 %v417_v51, %v609_v61  ;;  %v671_v44 = vsub.f32 %v287_v25, %v479_v30  ;;  %v242_v55 = vld [vmem:[%s2072_s28 + $0x58] sm:$0xff]  ;;  %v440_v30 = vld [vmem:[%s2079_s24 + $0x88] sm:$0xff]  ;;  %v593_v22 = vld [vmem:[%s2079_s24 + $0x550] sm:$0xff] }
  0xdd   : > { %1667 = vmatprep.subr.bf16.mxu1 %v1666_v3  ;;  %v380_v3 = vld [vmem:[%s2072_s28 + $0x4a8] sm:$0xff]  ;;  %v674_v45 = vsub.f32 %v290_v28, %v482_v31  ;;  %v812_v54 = vmul.f32 %v620_v39, %v620_v39  ;;  %v338_v61 = vld [vmem:[%s2072_s28 + $0x358] sm:$0xff]  ;;  %v437_v28 = vld [vmem:[%s2079_s24 + $0x70] sm:$0xff] }
  0xde   : > { %v764_v14 = vsub.f32 %v380_v3, %v572_v5  ;;  %v993_v26 = vmul.f32 %v801_v10, %v801_v10  ;;  %v863_v58 = vmul.f32 %v671_v44, %v671_v44  ;;  %v488_v3 = vld [vmem:[%s2079_s24 + $0x208] sm:$0xff]  ;;  %v623_v10 = vsub.f32 %v239_v52, %v431_v56  ;;  %v491_v39 = vld [vmem:[%s2079_s24 + $0x220] sm:$0xff] }
  0xdf   : > { %v866_v59 = vmul.f32 %v674_v45, %v674_v45  ;;  %v722_v20 = vsub.f32 %v338_v61, %v530_v7  ;;  %v536_v44 = vld [vmem:[%s2079_s24 + $0x388] sm:$0xff]  ;;  %v395_v45 = vld [vmem:[%s2072_s28 + $0x520] sm:$0xff]  ;;  %v305_v7 = vld [vmem:[%s2072_s28 + $0x250] sm:$0xff] }
  0xe0   : > { %v956_v33 = vmul.f32 %v764_v14, %v764_v14  ;;  %v584_v14 = vld [vmem:[%s2079_s24 + $0x508] sm:$0xff]  ;;  %v815_v25 = vmul.f32 %v623_v10, %v623_v10  ;;  %v251_v61 = vld [vmem:[%s2072_s28 + $0xa0] sm:$0xff] }
  0xe1   : > { %v1586_v15 = vpack.c.bf16 %v866_v59, %v863_v58  ;;  %v779_v59 = vsub.f32 %v395_v45, %v587_v50  ;;  %v308_v10 = vld [vmem:[%s2072_s28 + $0x268] sm:$0xff] }
  0xe2   : > { %1573 = vmatpush1.bf16.xpose.msra.mxu0 %v1572_v27  ;;  %v996_v27 = vmul.f32 %v804_v11, %v804_v11  ;;  %v1678_v49 = vpack.c.bf16 %v956_v33, %v953_v32  ;;  %v626_v11 = vsub.f32 %v242_v55, %v434_v57  ;;  %v341_v33 = vld [vmem:[%s2072_s28 + $0x370] sm:$0xff] }
  0xe3   : > { %1575 = vmatprep.subr.bf16.mxu0 %v1574_v34  ;;  %v521_v34 = vld [vmem:[%s2079_s24 + $0x310] sm:$0xff]  ;;  %v971_v13 = vmul.f32 %v779_v59, %v779_v59  ;;  %v599_v59 = vld [vmem:[%s2079_s24 + $0x580] sm:$0xff] }
  0xe4   : > { %1669 = vmatpush1.bf16.xpose.msra.mxu1 %v1668_v37  ;;  %v1580_v37 = vpack.c.bf16 %v900_v17, %v897_v16  ;;  %v1676_v46 = vpack.c.bf16 %v996_v27, %v993_v26  ;;  %v713_v47 = vsub.f32 %v329_v23, %v521_v34  ;;  %v677_v16 = vsub.f32 %v293_v62, %v485_v2  ;;  %v248_v27 = vld [vmem:[%s2072_s28 + $0x88] sm:$0xff]  ;;  %v446_v2 = vld [vmem:[%s2079_s24 + $0xb8] sm:$0xff] }
  0xe5   : > { %1671 = vmatprep.subr.bf16.mxu1 %v1670_v40  ;;  %v386_v40 = vld [vmem:[%s2072_s28 + $0x4d8] sm:$0xff]  ;;  %v680_v17 = vsub.f32 %v296_v1, %v488_v3  ;;  %v818_v26 = vmul.f32 %v626_v11, %v626_v11  ;;  %v344_v34 = vld [vmem:[%s2072_s28 + $0x388] sm:$0xff]  ;;  %v443_v1 = vld [vmem:[%s2079_s24 + $0xa0] sm:$0xff] }
  0xe6   : > { %v770_v51 = vsub.f32 %v386_v40, %v578_v42  ;;  %v905_v63 = vmul.f32 %v713_v47, %v713_v47  ;;  %v869_v31 = vmul.f32 %v677_v16, %v677_v16  ;;  %v494_v40 = vld [vmem:[%s2079_s24 + $0x238] sm:$0xff]  ;;  %v629_v47 = vsub.f32 %v245_v24, %v437_v28  ;;  %v497_v11 = vld [vmem:[%s2079_s24 + $0x250] sm:$0xff] }
  0xe7   : > { %v872_v32 = vmul.f32 %v680_v17, %v680_v17  ;;  %v728_v57 = vsub.f32 %v344_v34, %v536_v44  ;;  %v542_v16 = vld [vmem:[%s2079_s24 + $0x3b8] sm:$0xff]  ;;  %v401_v17 = vld [vmem:[%s2072_s28 + $0x550] sm:$0xff]  ;;  %v311_v44 = vld [vmem:[%s2072_s28 + $0x280] sm:$0xff] }
  0xe8   : > { %v962_v5 = vmul.f32 %v770_v51, %v770_v51  ;;  %v590_v51 = vld [vmem:[%s2079_s24 + $0x538] sm:$0xff]  ;;  %v821_v62 = vmul.f32 %v629_v47, %v629_v47  ;;  %v257_v34 = vld [vmem:[%s2072_s28 + $0xd0] sm:$0xff] }
  0xe9   : > { %v1590_v52 = vpack.c.bf16 %v872_v32, %v869_v31  ;;  %v785_v32 = vsub.f32 %v401_v17, %v593_v22  ;;  %v314_v47 = vld [vmem:[%s2072_s28 + $0x298] sm:$0xff] }
  0xea   : > { %1577 = vmatpush1.bf16.xpose.msra.mxu0 %v1576_v0  ;;  %v908_v0 = vmul.f32 %v716_v48, %v716_v48  ;;  %v1682_v21 = vpack.c.bf16 %v962_v5, %v959_v4  ;;  %v632_v48 = vsub.f32 %v248_v27, %v440_v30  ;;  %v347_v5 = vld [vmem:[%s2072_s28 + $0x3a0] sm:$0xff] }
  0xeb   : > { %1579 = vmatprep.subr.bf16.mxu0 %v1578_v6  ;;  %v527_v6 = vld [vmem:[%s2079_s24 + $0x340] sm:$0xff]  ;;  %v977_v50 = vmul.f32 %v785_v32, %v785_v32  ;;  %v605_v32 = vld [vmem:[%s2079_s24 + $0x5b0] sm:$0xff] }
  0xec   : > { %1673 = vmatpush1.bf16.xpose.msra.mxu1 %v1672_v9  ;;  %v1584_v9 = vpack.c.bf16 %v812_v54, %v809_v53  ;;  %v1680_v18 = vpack.c.bf16 %v908_v0, %v905_v63  ;;  %v719_v19 = vsub.f32 %v335_v60, %v527_v6  ;;  %v683_v53 = vsub.f32 %v299_v35, %v491_v39  ;;  %v254_v0 = vld [vmem:[%s2072_s28 + $0xb8] sm:$0xff]  ;;  %v452_v39 = vld [vmem:[%s2079_s24 + $0xe8] sm:$0xff] }
  0xed   : > { %1675 = vmatprep.subr.bf16.mxu1 %v1674_v12  ;;  %v392_v12 = vld [vmem:[%s2072_s28 + $0x508] sm:$0xff]  ;;  %v686_v54 = vsub.f32 %v302_v38, %v494_v40  ;;  %v824_v63 = vmul.f32 %v632_v48, %v632_v48  ;;  %v350_v6 = vld [vmem:[%s2072_s28 + $0x3b8] sm:$0xff]  ;;  %v449_v38 = vld [vmem:[%s2079_s24 + $0xd0] sm:$0xff] }
  0xee   : > { %v776_v23 = vsub.f32 %v392_v12, %v584_v14  ;;  %v911_v36 = vmul.f32 %v719_v19, %v719_v19  ;;  %v875_v3 = vmul.f32 %v683_v53, %v683_v53  ;;  %v500_v12 = vld [vmem:[%s2079_s24 + $0x268] sm:$0xff]  ;;  %v635_v19 = vsub.f32 %v251_v61, %v443_v1  ;;  %v503_v48 = vld [vmem:[%s2079_s24 + $0x280] sm:$0xff] }
  0xef   : > { %v878_v4 = vmul.f32 %v686_v54, %v686_v54  ;;  %v734_v30 = vsub.f32 %v350_v6, %v542_v16  ;;  %v548_v53 = vld [vmem:[%s2079_s24 + $0x3e8] sm:$0xff]  ;;  %v407_v54 = vld [vmem:[%s2072_s28 + $0x580] sm:$0xff]  ;;  %v317_v16 = vld [vmem:[%s2072_s28 + $0x2b0] sm:$0xff] }
  0xf0   : > { %v968_v42 = vmul.f32 %v776_v23, %v776_v23  ;;  %v596_v23 = vld [vmem:[%s2079_s24 + $0x568] sm:$0xff]  ;;  %v827_v35 = vmul.f32 %v635_v19, %v635_v19  ;;  %v263_v6 = vld [vmem:[%s2072_s28 + $0x100] sm:$0xff] }
  0xf1   : > { %v1594_v24 = vpack.c.bf16 %v878_v4, %v875_v3  ;;  %v791_v4 = vsub.f32 %v407_v54, %v599_v59  ;;  %v320_v19 = vld [vmem:[%s2072_s28 + $0x2c8] sm:$0xff] }
  0xf2   : > { %1581 = vmatpush1.bf16.xpose.msra.mxu0 %v1580_v37  ;;  %v914_v37 = vmul.f32 %v722_v20, %v722_v20  ;;  %v1686_v58 = vpack.c.bf16 %v968_v42, %v965_v41  ;;  %v638_v20 = vsub.f32 %v254_v0, %v446_v2  ;;  %v353_v42 = vld [vmem:[%s2072_s28 + $0x3d0] sm:$0xff] }
  0xf3   : > { %1583 = vmatprep.subr.bf16.mxu0 %v1582_v43  ;;  %v533_v43 = vld [vmem:[%s2079_s24 + $0x370] sm:$0xff]  ;;  %v983_v22 = vmul.f32 %v791_v4, %v791_v4  ;;  %v611_v4 = vld [vmem:[%s2079_s24 + $0x5e0] sm:$0xff] }
  0xf4   : > { %1677 = vmatpush1.bf16.xpose.msra.mxu1 %v1676_v46  ;;  %v1588_v46 = vpack.c.bf16 %v818_v26, %v815_v25  ;;  %v1684_v55 = vpack.c.bf16 %v914_v37, %v911_v36  ;;  %v725_v56 = vsub.f32 %v341_v33, %v533_v43  ;;  %v689_v25 = vsub.f32 %v305_v7, %v497_v11  ;;  %v260_v37 = vld [vmem:[%s2072_s28 + $0xe8] sm:$0xff]  ;;  %v458_v11 = vld [vmem:[%s2079_s24 + $0x118] sm:$0xff] }
  0xf5   : > { %1679 = vmatprep.subr.bf16.mxu1 %v1678_v49  ;;  %v398_v49 = vld [vmem:[%s2072_s28 + $0x538] sm:$0xff]  ;;  %v692_v26 = vsub.f32 %v308_v10, %v500_v12  ;;  %v830_v36 = vmul.f32 %v638_v20, %v638_v20  ;;  %v356_v43 = vld [vmem:[%s2072_s28 + $0x3e8] sm:$0xff]  ;;  %v455_v10 = vld [vmem:[%s2079_s24 + $0x100] sm:$0xff] }
  0xf6   : > { %v782_v60 = vsub.f32 %v398_v49, %v590_v51  ;;  %v917_v8 = vmul.f32 %v725_v56, %v725_v56  ;;  %v881_v40 = vmul.f32 %v689_v25, %v689_v25  ;;  %v506_v49 = vld [vmem:[%s2079_s24 + $0x298] sm:$0xff]  ;;  %v641_v56 = vsub.f32 %v257_v34, %v449_v38  ;;  %v509_v20 = vld [vmem:[%s2079_s24 + $0x2b0] sm:$0xff] }
  0xf7   : > { %v884_v41 = vmul.f32 %v692_v26, %v692_v26  ;;  %v740_v2 = vsub.f32 %v356_v43, %v548_v53  ;;  %v554_v25 = vld [vmem:[%s2079_s24 + $0x418] sm:$0xff]  ;;  %v413_v26 = vld [vmem:[%s2072_s28 + $0x5b0] sm:$0xff]  ;;  %v323_v53 = vld [vmem:[%s2072_s28 + $0x2e0] sm:$0xff] }
  0xf8   : > { %v974_v14 = vmul.f32 %v782_v60, %v782_v60  ;;  %v602_v60 = vld [vmem:[%s2079_s24 + $0x598] sm:$0xff]  ;;  %v833_v7 = vmul.f32 %v641_v56, %v641_v56  ;;  %v269_v43 = vld [vmem:[%s2072_s28 + $0x130] sm:$0xff] }
  0xf9   : > { %1064 = vmatmul.mubr.f32.vlgmr.msra.gmra.mrb[0].mxu0 %v1900_v29  ;;  %v1598_v61 = vpack.c.bf16 %v884_v41, %v881_v40  ;;  %v797_v41 = vsub.f32 %v413_v26, %v605_v32  ;;  %v326_v56 = vld [vmem:[%s2072_s28 + $0x2f8] sm:$0xff] }
  0xfa   : > { %1585 = vmatpush3.bf16.xpose.msra.mxu0 %v1584_v9  ;;  %1482 = vmatprep.mubr.f32.mxu0 %v1900_v29  ;;  %v920_v9 = vmul.f32 %v728_v57, %v728_v57  ;;  %v1690_v31 = vpack.c.bf16 %v974_v14, %v971_v13  ;;  %v644_v57 = vsub.f32 %v260_v37, %v452_v39  ;;  %v359_v14 = vld [vmem:[%s2072_s28 + $0x400] sm:$0xff] }
  0xfb   : > { %1206 = vmatmul.mubr.f32.vlgmr.msra.gmra.mrb[0].mxu1 %v1900_v29  ;;  %1587 = vmatprep.subr.bf16.mxu0 %v1586_v15  ;;  %v539_v15 = vld [vmem:[%s2079_s24 + $0x3a0] sm:$0xff]  ;;  %v989_v59 = vmul.f32 %v797_v41, %v797_v41 }
  0xfc   : > { %1681 = vmatpush3.bf16.xpose.msra.mxu1 %v1680_v18  ;;  %1516 = vmatprep.mubr.f32.mxu1 %v1900_v29  ;;  %v1592_v18 = vpack.c.bf16 %v824_v63, %v821_v62  ;;  %v1688_v27 = vpack.c.bf16 %v920_v9, %v917_v8  ;;  %v731_v28 = vsub.f32 %v347_v5, %v539_v15  ;;  %v266_v9 = vld [vmem:[%s2072_s28 + $0x118] sm:$0xff] }
  0xfd   : > { %1683 = vmatprep.subr.bf16.mxu1 %v1682_v21  ;;  %v404_v21 = vld [vmem:[%s2072_s28 + $0x568] sm:$0xff]  ;;  %v695_v62 = vsub.f32 %v311_v44, %v503_v48  ;;  %v698_v63 = vsub.f32 %v314_v47, %v506_v49  ;;  %v836_v8 = vmul.f32 %v644_v57, %v644_v57  ;;  %v362_v15 = vld [vmem:[%s2072_s28 + $0x418] sm:$0xff]  ;;  %v461_v47 = vld [vmem:[%s2079_s24 + $0x130] sm:$0xff] }
  0xfe   : > { %v788_v33 = vsub.f32 %v404_v21, %v596_v23  ;;  %v923_v45 = vmul.f32 %v731_v28, %v731_v28  ;;  %v512_v21 = vld [vmem:[%s2079_s24 + $0x2c8] sm:$0xff]  ;;  %v647_v28 = vsub.f32 %v263_v6, %v455_v10  ;;  %v746_v39 = vsub.f32 %v362_v15, %v554_v25  ;;  %v515_v57 = vld [vmem:[%s2079_s24 + $0x2e0] sm:$0xff] }
  0xff   : > { %v887_v12 = vmul.f32 %v695_v62, %v695_v62  ;;  %v890_v13 = vmul.f32 %v698_v63, %v698_v63  ;;  %v464_v48 = vld [vmem:[%s2079_s24 + $0x148] sm:$0xff]  ;;  %v419_v63 = vld [vmem:[%s2072_s28 + $0x5e0] sm:$0xff] }
 0x100   : > { %v980_v51 = vmul.f32 %v788_v33, %v788_v33  ;;  %v608_v33 = vld [vmem:[%s2079_s24 + $0x5c8] sm:$0xff]  ;;  %v839_v44 = vmul.f32 %v647_v28, %v647_v28  ;;  %v371_v25 = vld [vmem:[%s2072_s28 + $0x460] sm:$0xff]  ;;  %v374_v28 = vld [vmem:[%s2072_s28 + $0x478] sm:$0xff] }
 0x101   : > { %v1602_v34 = vpack.c.bf16 %v890_v13, %v887_v12  ;;  %v560_v62 = vld [vmem:[%s2079_s24 + $0x448] sm:$0xff]  ;;  %v803_v13 = vsub.f32 %v419_v63, %v611_v4 }
 0x102   : > { %1589 = vmatpush3.bf16.xpose.msra.mxu0 %v1588_v46  ;;  %v926_v46 = vmul.f32 %v734_v30, %v734_v30  ;;  %v1694_v3 = vpack.c.bf16 %v980_v51, %v977_v50  ;;  %v650_v30 = vsub.f32 %v266_v9, %v458_v11  ;;  %v365_v51 = vld [vmem:[%s2072_s28 + $0x430] sm:$0xff] }
 0x103   : > { %1591 = vmatprep.subr.bf16.mxu0 %v1590_v52  ;;  %v545_v52 = vld [vmem:[%s2079_s24 + $0x3d0] sm:$0xff]  ;;  %v995_v26 = vmul.f32 %v803_v13, %v803_v13 }
 0x104   : > { %1685 = vmatpush3.bf16.xpose.msra.mxu1 %v1684_v55  ;;  %v1596_v55 = vpack.c.bf16 %v830_v36, %v827_v35  ;;  %v1692_v0 = vpack.c.bf16 %v926_v46, %v923_v45  ;;  %v737_v1 = vsub.f32 %v353_v42, %v545_v52  ;;  %v701_v35 = vsub.f32 %v317_v16, %v509_v20  ;;  %v272_v46 = vld [vmem:[%s2072_s28 + $0x148] sm:$0xff]  ;;  %v278_v20 = vld [vmem:[%s2072_s28 + $0x178] sm:$0xff] }
 0x105   : > { %1687 = vmatprep.subr.bf16.mxu1 %v1686_v58  ;;  %v410_v58 = vld [vmem:[%s2072_s28 + $0x598] sm:$0xff]  ;;  %v704_v36 = vsub.f32 %v320_v19, %v512_v21  ;;  %v842_v45 = vmul.f32 %v650_v30, %v650_v30  ;;  %v368_v52 = vld [vmem:[%s2072_s28 + $0x448] sm:$0xff]  ;;  %v467_v21 = vld [vmem:[%s2079_s24 + $0x160] sm:$0xff] }
 0x106   : > { %v794_v5 = vsub.f32 %v410_v58, %v602_v60  ;;  %v929_v17 = vmul.f32 %v737_v1, %v737_v1  ;;  %v893_v49 = vmul.f32 %v701_v35, %v701_v35  ;;  %v518_v58 = vld [vmem:[%s2079_s24 + $0x2f8] sm:$0xff]  ;;  %v653_v1 = vsub.f32 %v269_v43, %v461_v47  ;;  %v563_v30 = vld [vmem:[%s2079_s24 + $0x460] sm:$0xff] }
 0x107   : > { %v896_v50 = vmul.f32 %v704_v36, %v704_v36  ;;  %v752_v11 = vsub.f32 %v368_v52, %v560_v62 }
 0x108   : > { %v986_v23 = vmul.f32 %v794_v5, %v794_v5  ;;  %v614_v5 = vld [vmem:[%s2079_s24 + $0x5f8] sm:$0xff]  ;;  %v845_v15 = vmul.f32 %v653_v1, %v653_v1 }
 0x109   : > { %v1606_v6 = vpack.c.bf16 %v896_v50, %v893_v49 }
 0x10a   : > { %1593 = vmatpush3.bf16.xpose.msra.mxu0 %v1592_v18  ;;  %v932_v18 = vmul.f32 %v740_v2, %v740_v2  ;;  %v1698_v40 = vpack.c.bf16 %v986_v23, %v983_v22  ;;  %v656_v2 = vsub.f32 %v272_v46, %v464_v48  ;;  %v470_v22 = vld [vmem:[%s2079_s24 + $0x178] sm:$0xff]  ;;  %v1901_v46 = vmov 1966171168  }
 0x10b   : > { %1595 = vmatprep.subr.bf16.mxu0 %v1594_v24  ;;  %v551_v24 = vld [vmem:[%s2079_s24 + $0x400] sm:$0xff]  ;;  %v1290_v47 = vunpack.c.l.s4 %v1901_v46  ;;  %v1292_v48 = vlaneseq }
 0x10c   : > { %1689 = vmatpush3.bf16.xpose.msra.mxu1 %v1688_v27  ;;  %v1600_v27 = vpack.c.bf16 %v836_v8, %v833_v7  ;;  %v1696_v37 = vpack.c.bf16 %v932_v18, %v929_v17  ;;  %v743_v38 = vsub.f32 %v359_v14, %v551_v24  ;;  %v707_v7 = vsub.f32 %v323_v53, %v515_v57  ;;  %v275_v17 = vld [vmem:[%s2072_s28 + $0x160] sm:$0xff] }
 0x10d   : > { %1691 = vmatprep.subr.bf16.mxu1 %v1690_v31  ;;  %v416_v31 = vld [vmem:[%s2072_s28 + $0x5c8] sm:$0xff]  ;;  %v710_v8 = vsub.f32 %v326_v56, %v518_v58  ;;  %v848_v16 = vmul.f32 %v656_v2, %v656_v2  ;;  %v944_v24 = vmul.f32 %v752_v11, %v752_v11  ;;  %v1291_v49 = vunpack.c.0.s8 %v1290_v47 }
 0x10e   : > { %v800_v42 = vsub.f32 %v416_v31, %v608_v33  ;;  %v935_v54 = vmul.f32 %v743_v38, %v743_v38  ;;  %v899_v18 = vmul.f32 %v707_v7, %v707_v7  ;;  %v566_v31 = vld [vmem:[%s2079_s24 + $0x478] sm:$0xff]  ;;  %v659_v33 = vsub.f32 %v275_v17, %v467_v21 }
 0x10f   : > { %v902_v19 = vmul.f32 %v710_v8, %v710_v8  ;;  %v1608_v32 = vpack.c.bf16 %v848_v16, %v845_v15  ;;  %v758_v38 = vsub.f32 %v374_v28, %v566_v31  ;;  %v1293_v50 = vshrl.u32 %v1292_v48, 7 }
 0x110   : > { %v992_v60 = vmul.f32 %v800_v42, %v800_v42  ;;  %vm1314_vm0 = vcmp.lt.s32.totalorder %v1292_v48, 512 }
 0x111   : > { %v1610_v35 = vpack.c.bf16 %v902_v19, %v899_v18  ;;  %v950_v43 = vmul.f32 %v758_v38, %v758_v38  ;;  %v1294_v52 = vsub.s32 %v1291_v49, %v1293_v50 }
 0x112   : > { %1597 = vmatpush3.bf16.xpose.msra.mxu0 %v1596_v55  ;;  %v938_v55 = vmul.f32 %v746_v39, %v746_v39  ;;  %v1702_v12 = vpack.c.bf16 %v992_v60, %v989_v59 }
 0x113   : > { %1599 = vmatprep.subr.bf16.mxu0 %v1598_v61  ;;  %v557_v61 = vld [vmem:[%s2079_s24 + $0x430] sm:$0xff] }
 0x114   : > { %1693 = vmatpush3.bf16.xpose.msra.mxu1 %v1692_v0  ;;  %v1604_v0 = vpack.c.bf16 %v842_v45, %v839_v44  ;;  %v1700_v9 = vpack.c.bf16 %v938_v55, %v935_v54  ;;  %v749_v10 = vsub.f32 %v365_v51, %v557_v61 }
 0x115   : > { %1695 = vmatprep.subr.bf16.mxu1 %v1694_v3  ;;  %v422_v3 = vld [vmem:[%s2072_s28 + $0x5f8] sm:$0xff] }
 0x116   : > { %v806_v14 = vsub.f32 %v422_v3, %v614_v5  ;;  %v941_v23 = vmul.f32 %v749_v10, %v749_v10 }
 0x118   : > { %v1704_v36 = vpack.c.bf16 %v944_v24, %v941_v23 }
 0x11a   : > { %1601 = vmatpush3.bf16.xpose.msra.mxu0 %v1600_v27  ;;  %v998_v27 = vmul.f32 %v806_v14, %v806_v14 }
 0x11b   : > { %1603 = vmatprep.subr.bf16.mxu0 %v1602_v34  ;;  %v662_v34 = vsub.f32 %v278_v20, %v470_v22 }
 0x11c   : > { %1697 = vmatpush3.bf16.xpose.msra.mxu1 %v1696_v37  ;;  %v755_v37 = vsub.f32 %v371_v25, %v563_v30  ;;  %v1706_v39 = vpack.c.bf16 %v998_v27, %v995_v26 }
 0x11d   : > { %1699 = vmatprep.subr.bf16.mxu1 %v1698_v40  ;;  %v851_v40 = vmul.f32 %v659_v33, %v659_v33  ;;  %v854_v41 = vmul.f32 %v662_v34, %v662_v34 }
 0x11e   : > { %v947_v42 = vmul.f32 %v755_v37, %v755_v37 }
 0x11f   : > { %v1612_v44 = vpack.c.bf16 %v854_v41, %v851_v40 }
 0x120   : > { %v1708_v45 = vpack.c.bf16 %v950_v43, %v947_v42 }
 0x122   : > { %1605 = vmatpush3.bf16.xpose.msra.mxu0 %v1604_v0 }
 0x123   : > { %1607 = vmatprep.subr.bf16.mxu0 %v1606_v6 }
 0x124   : > { %1701 = vmatpush3.bf16.xpose.msra.mxu1 %v1700_v9 }
 0x125   : > { %1703 = vmatprep.subr.bf16.mxu1 %v1702_v12 }
 0x12a   : > { %1609 = vmatpush3.bf16.xpose.msra.mxu0 %v1608_v32 }
 0x12b   : > { %1611 = vmatprep.subr.bf16.mxu0 %v1610_v35 }
 0x12c   : > { %1705 = vmatpush3.bf16.xpose.msra.mxu1 %v1704_v36 }
 0x12d   : > { %1707 = vmatprep.subr.bf16.mxu1 %v1706_v39 }
 0x132   : > { %1613 = vmatpush3.bf16.xpose.msra.mxu0 %v1612_v44 }
 0x134   : > { %1709 = vmatpush3.bf16.xpose.msra.mxu1 %v1708_v45 }
 0x139   : > { %1483 = vmatmul.mubr.f32.vlgmr.msra.gmra.mrb[0].mxu0 %v1900_v29 }
 0x13b   : > { %1517 = vmatmul.mubr.f32.vlgmr.msra.gmra.mrb[0].mxu1 %v1900_v29 }
 0x20c   : > { %v1136_v51 = vpop.f32.mrb[0].mxu0 }
 0x20d   : > { %v1138_v53 = vpop.f32.mrb[1].mxu0 }
 0x20e   : > { %v1278_v54 = vpop.f32.mrb[0].mxu1  ;;  %v1287_v55 = vcombine.low %v1136_v51, %v1138_v53 }
 0x20f   : > { %v1280_v56 = vpop.f32.mrb[1].mxu1 }
 0x210   : > { %v1295_v57 = vrot.slane %v1287_v55, %v1294_v52  ;;  %v1288_v58 = vcombine.low %v1278_v54, %v1280_v56 }
 0x212   : > { %v1302_v59 = vrot.slane %v1288_v58, %v1294_v52 }
 0x214   : > { %v1303_v29 = vcombine.low %v1295_v57, %v1302_v59 }
 0x216   : > { %v1310_v60 = vrot.slane %v1303_v29, %v1294_v52 }
 0x218   : > { %1316 = vst.msk [vmem:[%s217_s25] sm:$0xf] %vm1314_vm0, %v1310_v60 }
 0x219   : > { %1835 = shalt.err (!%p1832_p10)
}
 0x21a   : > { %s1836_s27 = scalar_lea.hbm %s2482_s6, 64  ;;  %s1840_s7 = scalar_lea.hbm %s2528_s2, 128 }
 0x21b   : > { %p1837_p11 = scmp.ne.s32.totalorder %s2482_s6, %s1836_s27  ;;  %p1841_p13 = scmp.lt.u32.totalorder %s2482_s6, %s2528_s2 }
 0x21c   : > { %p1842_p12 = scmp.lt.u32.totalorder %s1840_s7, %s1836_s27  ;;  %p1844_p6 = scmp.lt.u32.totalorder %s1836_s27, %s2482_s6 }
 0x21d   : > { %p1838_p2 = pnand %p1837_p11, %p2535_p5 }
 0x21e   : > { %p1843_p0 = por %p1842_p12, %p1841_p13 }
 0x21f   : > { %p1839_p8 = pneg %p1838_p2 }
 0x220   : > { %p1845_p1 = por %p1844_p6, %p1843_p0 }
 0x222   : > { %p1846_p3 = pnand %p1845_p1, %p1839_p8 }
 0x224   : > { %1849 = shalt.err (!%p1846_p3)
}
 0x225   : > { %1721 = dma.vmem_to_hbm [thread:$0]  (%p2535_p5), %s2484_s30, 64, %s2482_s6, %s1318_s8  }
 0x226 PF: > { %s1344_s17 = sand.u32 1, %s1880_s9   ;;  %p2536_p4 = scmp.ne.s32.totalorder %s2534_s22, 0 }
 0x227   : > { %p2537_p7 = scmp.ge.s32.totalorder %s1892_s12, 2  ;;  %s1345_s24 = scalar_lea.sflag [#allocation4], %s1344_s17 }
 0x229   : > { %p1724_p9 = pnand %p2537_p7, %p2536_p4 }
 0x22b   : > { %1875 = dma.done.wait (!%p1724_p9), %s1345_s24, 64  }
 0x22c   : > { %1877 = vsyncadd (!%p1724_p9), %s1345_s24, 4294967232  ;;  %p18_p10 = scmp.ge.s32.totalorder %s1943_s15, 4   ;;  %s2538_s9 = smov %s1884_s10 }
 0x22d   : > { %s2539_s10 = smov %s1888_s11  ;;  %s2540_s11 = smov %s1955_s18 }
 0x22e   : > { %s2541_s12 = smov %s1943_s15  ;;  %20 = sbr.rel (!%p18_p10) target bundleno = 7 (0x7), region = 86 }
 0x235   :  { %1350 = vsyncpa [#allocation3], 1 }
 0x236   :  { %1352 = vsyncpa [#allocation3 + $0x1], 1 }
 0x237   :  { %1353 = vsyncpa [#allocation6], 1 }
 0x238   :  { %1355 = vsyncpa [#allocation6 + $0x1], 1 }
 0x239   :  { %1356 = vsyncpa [#allocation4], 1 }
 0x23a   :  { %1358 = vsyncpa [#allocation4 + $0x1], 1 }

</bundles_post_ra>
